<compile_context>
chip_gen: v6e
topology: v6e:2x2x1
jax: 0.10.0
libtpu: 0.0.40
codegen_flags: <defaults>
</compile_context>

<pallas_src>
import functools

import jax
import jax.numpy as jnp
from jax.experimental import pallas as pl
from jax.experimental.pallas import tpu as pltpu

_HP = jax.lax.Precision.HIGHEST


def _round_up(n, m):
    return ((n + m - 1) // m) * m


def _tst_llm_kernel(M, P, x_ref, w1_ref, b1_ref, wc_ref, bc_ref, out_ref):
    """Single-invocation forward: Linear1 + ReLU + fused (Linear2∘heads) + L2 norm."""
    # h = ReLU(x @ W1 + b1); padded hidden columns stay exactly zero.
    h = jnp.dot(x_ref[...], w1_ref[...],
                preferred_element_type=jnp.float32, precision=_HP) + b1_ref[...]
    h = jnp.maximum(h, 0.0)

    # All M heads (with Linear2 pre-folded) in one lane-dense matmul -> [B, M*P].
    proj_all = jnp.dot(h, wc_ref[...],
                       preferred_element_type=jnp.float32, precision=_HP) + bc_ref[...]

    # Per-head row-wise L2 normalize, stored directly as [M, B, P] slabs.
    # rsqrt(max(norm^2, 1e-24)) == 1 / max(norm, 1e-12)  (PyTorch F.normalize eps).
    for m in range(M):  # M is tiny and static -> unrolled, static slices/stores.
        p = proj_all[:, m * P:(m + 1) * P]
        inv = jax.lax.rsqrt(
            jnp.maximum(jnp.sum(p * p, axis=1, keepdims=True), 1e-24))
        out_ref[m] = (p * inv).astype(out_ref.dtype)


def pack_tst_llm_weights(w1, b1, w2, b2, wh, bh, lane=128):
    """One-time weight packing (run at load time, NOT per forward call).

    Pads hidden to a lane multiple and folds Linear2 into the M heads:
        feat @ Wh[m] + bh[m] == h @ (W2 @ Wh[m]) + (b2 @ Wh[m] + bh[m]).
    """
    in_features, hidden = w1.shape
    M, _, proj = wh.shape
    hid_p = _round_up(hidden, lane)

    w1_p = jnp.pad(w1, ((0, 0), (0, hid_p - hidden)))
    b1_p = jnp.pad(b1, (0, hid_p - hidden)).reshape(1, hid_p)

    # Pack heads back-to-back along lanes: [hidden, M*proj] (proj=128 -> aligned).
    wh_packed = jnp.transpose(wh, (1, 0, 2)).reshape(hidden, M * proj)
    wc = jnp.dot(w2, wh_packed, precision=_HP)                      # [hidden, M*proj]
    bc = jnp.dot(b2, wh_packed, precision=_HP) + bh.reshape(M * proj)
    wc_p = jnp.pad(wc, ((0, hid_p - hidden), (0, 0)))               # [hid_p, M*proj]
    bc_p = bc.reshape(1, M * proj)
    return w1_p, b1_p, wc_p, bc_p


def make_tst_llm_forward(M, proj_dim):
    kernel = functools.partial(_tst_llm_kernel, M, proj_dim)
    vmem = pl.BlockSpec(memory_space=pltpu.MemorySpace.VMEM)

    @jax.jit
    def fwd(x, w1_p, b1_p, wc_p, bc_p):
        B = x.shape[0]
        out = pl.pallas_call(
            kernel,
            out_shape=jax.ShapeDtypeStruct((M, B, proj_dim), jnp.float32),
            in_specs=[vmem] * 5,
            out_specs=vmem,
        )(x, w1_p, b1_p, wc_p, bc_p)
        # (new_feat, None) to mirror the PyTorch module's return signature;
        # new_feat[m] == F.normalize(head_m(encoder(x)), dim=1).
        return out, None

    return fwd


def _reference_forward(x, w1, b1, w2, b2, wh, bh):
    """Plain-JAX, unfused reference matching the original PyTorch module."""
    h = jnp.maximum(jnp.dot(x, w1, precision=_HP) + b1, 0.0)
    feat = jnp.dot(h, w2, precision=_HP) + b2
    outs = []
    for m in range(wh.shape[0]):
        p = jnp.dot(feat, wh[m], precision=_HP) + bh[m]
        n = jnp.sqrt(jnp.sum(p * p, axis=1, keepdims=True))
        outs.append(p / jnp.maximum(n, 1e-12))
    return jnp.stack(outs, axis=0)


if __name__ == "__main__":
    # Small shapes consistent with the module (proj_dim matches the module default).
    B, in_features, hidden_dim, proj_dim, M = 8, 32, 64, 128, 3

    key = jax.random.PRNGKey(0)
    ks = jax.random.split(key, 7)

    def lin_init(kw, kb, fan_in, shape_w, shape_b):
        bound = 1.0 / jnp.sqrt(fan_in)
        w = jax.random.uniform(kw, shape_w, jnp.float32, -bound, bound)
        b = jax.random.uniform(kb, shape_b, jnp.float32, -bound, bound)
        return w, b

    x = jax.random.normal(ks[0], (B, in_features), jnp.float32)
    w1, b1 = lin_init(ks[1], ks[2], in_features,
                      (in_features, hidden_dim), (hidden_dim,))
    w2, b2 = lin_init(ks[3], ks[4], hidden_dim,
                      (hidden_dim, hidden_dim), (hidden_dim,))
    wh, bh = lin_init(ks[5], ks[6], hidden_dim,
                      (M, hidden_dim, proj_dim), (M, proj_dim))

    # One-time packing (hoisted out of the per-call path).
    packed = pack_tst_llm_weights(w1, b1, w2, b2, wh, bh)
    packed = tuple(jax.block_until_ready(p) for p in packed)

    fwd = make_tst_llm_forward(M, proj_dim)
    new_feat, aux = fwd(x, *packed)
    new_feat = jax.block_until_ready(new_feat)
    assert aux is None
    assert new_feat.shape == (M, B, proj_dim)

    # Correctness check vs plain-JAX (unfused) reference.
    ref = _reference_forward(x, w1, b1, w2, b2, wh, bh)
    assert jnp.allclose(new_feat, ref, atol=2e-5, rtol=2e-5), "mismatch vs reference"

    print("KERNEL_OK")
</pallas_src>

<mosaic_0001>
module attributes {stable_mosaic.version = 11 : i64} {
  func.func @_tst_llm_kernel(%arg0: memref<8x32xf32, #tpu.memory_space<vmem>>, %arg1: memref<32x128xf32, #tpu.memory_space<vmem>>, %arg2: memref<1x128xf32, #tpu.memory_space<vmem>>, %arg3: memref<128x384xf32, #tpu.memory_space<vmem>>, %arg4: memref<1x384xf32, #tpu.memory_space<vmem>>, %arg5: memref<3x8x128xf32, #tpu.memory_space<vmem>>) attributes {dimension_semantics = [], scalar_prefetch = 0 : i64, scratch_operands = 0 : i64, tpu.core_type = #tpu.core_type<tc>} {
    %c0 = arith.constant 0 : index
    %c0_0 = arith.constant 0 : index
    %0 = vector.load %arg0[%c0, %c0_0] : memref<8x32xf32, #tpu.memory_space<vmem>>, vector<8x32xf32>
    %c0_1 = arith.constant 0 : index
    %c0_2 = arith.constant 0 : index
    %1 = vector.load %arg1[%c0_1, %c0_2] : memref<32x128xf32, #tpu.memory_space<vmem>>, vector<32x128xf32>
    %cst = arith.constant dense<0.000000e+00> : vector<8x128xf32>
    %2 = tpu.matmul %0, %1, %cst {dimension_numbers = #tpu.dot_dimension_numbers<[1], [0], [0], [1], [0, 0, 1, 1], [], []>, precision = #tpu.contract_precision<fp32>} : vector<8x32xf32>, vector<32x128xf32>, vector<8x128xf32> -> vector<8x128xf32>
    %c0_3 = arith.constant 0 : index
    %c0_4 = arith.constant 0 : index
    %3 = vector.load %arg2[%c0_3, %c0_4] : memref<1x128xf32, #tpu.memory_space<vmem>>, vector<1x128xf32>
    %4 = vector.broadcast %3 : vector<1x128xf32> to vector<8x128xf32>
    %5 = arith.addf %2, %4 : vector<8x128xf32>
    %cst_5 = arith.constant 0.000000e+00 : f32
    %6 = vector.broadcast %cst_5 : f32 to vector<8x128xf32>
    %7 = arith.maximumf %5, %6 : vector<8x128xf32>
    %c0_6 = arith.constant 0 : index
    %c0_7 = arith.constant 0 : index
    %8 = vector.load %arg3[%c0_6, %c0_7] : memref<128x384xf32, #tpu.memory_space<vmem>>, vector<128x384xf32>
    %cst_8 = arith.constant dense<0.000000e+00> : vector<8x384xf32>
    %9 = tpu.matmul %7, %8, %cst_8 {dimension_numbers = #tpu.dot_dimension_numbers<[1], [0], [0], [1], [0, 0, 1, 1], [], []>, precision = #tpu.contract_precision<fp32>} : vector<8x128xf32>, vector<128x384xf32>, vector<8x384xf32> -> vector<8x384xf32>
    %c0_9 = arith.constant 0 : index
    %c0_10 = arith.constant 0 : index
    %10 = vector.load %arg4[%c0_9, %c0_10] : memref<1x384xf32, #tpu.memory_space<vmem>>, vector<1x384xf32>
    %11 = vector.broadcast %10 : vector<1x384xf32> to vector<8x384xf32>
    %12 = arith.addf %9, %11 : vector<8x384xf32>
    %13 = vector.extract_strided_slice %12 {offsets = [0, 0], sizes = [8, 128], strides = [1, 1]} : vector<8x384xf32> to vector<8x128xf32>
    %14 = arith.mulf %13, %13 : vector<8x128xf32>
    %cst_11 = arith.constant dense<0.000000e+00> : vector<8xf32>
    %15 = vector.multi_reduction <add>, %14, %cst_11 [1] : vector<8x128xf32> to vector<8xf32>
    %16 = vector.shape_cast %15 : vector<8xf32> to vector<8x1xf32>
    %cst_12 = arith.constant 1.000000e-24 : f32
    %17 = vector.broadcast %cst_12 : f32 to vector<8x1xf32>
    %18 = arith.maximumf %16, %17 : vector<8x1xf32>
    %19 = math.rsqrt %18 : vector<8x1xf32>
    %20 = vector.broadcast %19 : vector<8x1xf32> to vector<8x128xf32>
    %21 = arith.mulf %13, %20 : vector<8x128xf32>
    %c0_13 = arith.constant 0 : index
    %c0_14 = arith.constant 0 : index
    %c0_15 = arith.constant 0 : index
    %22 = vector.load %arg5[%c0_13, %c0_14, %c0_15] : memref<3x8x128xf32, #tpu.memory_space<vmem>>, vector<1x8x128xf32>
    %23 = vector.shape_cast %22 : vector<1x8x128xf32> to vector<8x128xf32>
    %24 = vector.shape_cast %21 : vector<8x128xf32> to vector<1x8x128xf32>
    tpu.vector_store %arg5[%c0_13, %c0_14, %c0_15], %24 {strides = array<i32>} : memref<3x8x128xf32, #tpu.memory_space<vmem>>, vector<1x8x128xf32>,
    %25 = vector.extract_strided_slice %12 {offsets = [0, 128], sizes = [8, 128], strides = [1, 1]} : vector<8x384xf32> to vector<8x128xf32>
    %26 = arith.mulf %25, %25 : vector<8x128xf32>
    %cst_16 = arith.constant dense<0.000000e+00> : vector<8xf32>
    %27 = vector.multi_reduction <add>, %26, %cst_16 [1] : vector<8x128xf32> to vector<8xf32>
    %28 = vector.shape_cast %27 : vector<8xf32> to vector<8x1xf32>
    %cst_17 = arith.constant 1.000000e-24 : f32
    %29 = vector.broadcast %cst_17 : f32 to vector<8x1xf32>
    %30 = arith.maximumf %28, %29 : vector<8x1xf32>
    %31 = math.rsqrt %30 : vector<8x1xf32>
    %32 = vector.broadcast %31 : vector<8x1xf32> to vector<8x128xf32>
    %33 = arith.mulf %25, %32 : vector<8x128xf32>
    %c1 = arith.constant 1 : index
    %c0_18 = arith.constant 0 : index
    %c0_19 = arith.constant 0 : index
    %34 = vector.load %arg5[%c1, %c0_18, %c0_19] : memref<3x8x128xf32, #tpu.memory_space<vmem>>, vector<1x8x128xf32>
    %35 = vector.shape_cast %34 : vector<1x8x128xf32> to vector<8x128xf32>
    %36 = vector.shape_cast %33 : vector<8x128xf32> to vector<1x8x128xf32>
    tpu.vector_store %arg5[%c1, %c0_18, %c0_19], %36 {strides = array<i32>} : memref<3x8x128xf32, #tpu.memory_space<vmem>>, vector<1x8x128xf32>,
    %37 = vector.extract_strided_slice %12 {offsets = [0, 256], sizes = [8, 128], strides = [1, 1]} : vector<8x384xf32> to vector<8x128xf32>
    %38 = arith.mulf %37, %37 : vector<8x128xf32>
    %cst_20 = arith.constant dense<0.000000e+00> : vector<8xf32>
    %39 = vector.multi_reduction <add>, %38, %cst_20 [1] : vector<8x128xf32> to vector<8xf32>
    %40 = vector.shape_cast %39 : vector<8xf32> to vector<8x1xf32>
    %cst_21 = arith.constant 1.000000e-24 : f32
    %41 = vector.broadcast %cst_21 : f32 to vector<8x1xf32>
    %42 = arith.maximumf %40, %41 : vector<8x1xf32>
    %43 = math.rsqrt %42 : vector<8x1xf32>
    %44 = vector.broadcast %43 : vector<8x1xf32> to vector<8x128xf32>
    %45 = arith.mulf %37, %44 : vector<8x128xf32>
    %c2 = arith.constant 2 : index
    %c0_22 = arith.constant 0 : index
    %c0_23 = arith.constant 0 : index
    %46 = vector.load %arg5[%c2, %c0_22, %c0_23] : memref<3x8x128xf32, #tpu.memory_space<vmem>>, vector<1x8x128xf32>
    %47 = vector.shape_cast %46 : vector<1x8x128xf32> to vector<8x128xf32>
    %48 = vector.shape_cast %45 : vector<8x128xf32> to vector<1x8x128xf32>
    tpu.vector_store %arg5[%c2, %c0_22, %c0_23], %48 {strides = array<i32>} : memref<3x8x128xf32, #tpu.memory_space<vmem>>, vector<1x8x128xf32>,
    return
  }
}

</mosaic_0001>

<bundles_post_ra>
// kernel: fwd.1
= control target key start
LH: loop header
LB: loop body
LE: loop exit
PB: predicated region body
PF: predicated region fallthrough
CT: control target
= control target key end

     0   :  { %10 = vsyncpa [#allocation3], 0  ;;  %s3700_s0 = inlined_call_operand.hbm [shape: f32[8,32], index: 0, kind: input, shape index: {}]   ;;  %s3701_s1 = inlined_call_operand.hbm [shape: f32[32,128], index: 1, kind: input, shape index: {}]   ;;  %s3702_s2 = inlined_call_operand.vmem [shape: f32[1,128], index: 2, kind: input, shape index: {}]   ;;  %s3703_s3 = inlined_call_operand.hbm [shape: f32[128,384], index: 3, kind: input, shape index: {}]   ;;  %s3704_s4 = inlined_call_operand.vmem [shape: f32[1,384], index: 4, kind: input, shape index: {}]   ;;  %s3705_s5 = inlined_call_operand.hbm [shape: f32[3,8,128], index: 5, kind: output, shape index: {}]  }
   0x1   :  { %11 = vsyncpa [#allocation6], 0 }
   0x2   :  { %12 = vsyncpa [#allocation4], 0  ;;  %s2675_s18 = smov [#allocation5]  }
   0x3   :  { %s28_s19 = sshll.u32 %s2675_s18, 4  ;;  %s29_s19 = int_to_ptr.vmem [resolvable:$true] %s28_s19 }
   0x4   :  { %s2597_s20 = scalar_lea.vmem %s29_s19, 512  ;;  %p2602_p1 = scmp.lt.s32.totalorder %s29_s19, %s29_s19 }
   0x5   :  { %p2598_p0 = scmp.ne.s32.totalorder %s29_s19, %s2597_s20  ;;  %p2603_p2 = scmp.lt.s32.totalorder %s2597_s20, %s2597_s20 }
   0x7   :  { %p2604_p3 = por %p2603_p2, %p2602_p1 }
   0x9   :  { %p2605_p4 = pnand %p2604_p3, %p2598_p0 }
   0xb   :  { %2608 = shalt.err (!%p2605_p4)
}
   0xc   :  { %s2676_s21 = smov 128   ;;  %s2677_s22 = smov 8  }
   0xd   :  { %34 = dma.hbm_to_vmem [thread:$0]  %s3701_s1, 512, %s29_s19, [#allocation6], %s2676_s21, %s2676_s21, %s2677_s22  }
   0xe   :  { %s2678_s25 = smov [#allocation2]   ;;  %s2679_s27 = smov [#allocation7]  }
   0xf   :  { %s19_s26 = sshll.u32 %s2678_s25, 4  ;;  %s42_s28 = sshll.u32 %s2679_s27, 4  ;;  %s20_s26 = int_to_ptr.vmem [resolvable:$true] %s19_s26  ;;  %s43_s28 = int_to_ptr.vmem [resolvable:$true] %s42_s28 }
  0x10   :  { %s2617_s29 = scalar_lea.vmem %s20_s26, 128  ;;  %p2622_p6 = scmp.lt.s32.totalorder %s20_s26, %s20_s26 }
  0x11   :  { %p2618_p5 = scmp.ne.s32.totalorder %s20_s26, %s2617_s29  ;;  %p2623_p7 = scmp.lt.s32.totalorder %s2617_s29, %s2617_s29 }
  0x13   :  { %p2624_p8 = por %p2623_p7, %p2622_p6 }
  0x15   :  { %p2625_p9 = pnand %p2624_p8, %p2618_p5 }
  0x17   :  { %2628 = shalt.err (!%p2625_p9)
}
  0x18   :  { %22 = dma.hbm_to_vmem [thread:$0]  %s3700_s0, 128, %s20_s26, [#allocation3]  }
  0x19   :  { %s2637_s7 = scalar_lea.vmem %s43_s28, 6144  ;;  %p2642_p11 = scmp.lt.s32.totalorder %s43_s28, %s43_s28 }
  0x1a   :  { %p2638_p10 = scmp.ne.s32.totalorder %s43_s28, %s2637_s7  ;;  %p2643_p12 = scmp.lt.s32.totalorder %s2637_s7, %s2637_s7 }
  0x1c   :  { %p2644_p13 = por %p2643_p12, %p2642_p11 }
  0x1e   :  { %p2645_p0 = pnand %p2644_p13, %p2638_p10 }
  0x20   :  { %2648 = shalt.err (!%p2645_p0)
}
  0x21   :  { %s2680_s1 = smov 384   ;;  %s2681_s8 = smov 24  }
  0x22   :  { %48 = dma.hbm_to_vmem [thread:$0]  %s3703_s3, 6144, %s43_s28, [#allocation6], %s2680_s1, %s2680_s1, %s2681_s8  }
  0x23   :  { %2669 = dma.done.wait [#allocation3], 128  }
  0x24   :  { %2670 = vsyncadd [#allocation3], 4294967168 }
  0x25   :  { %2671 = dma.done.wait [#allocation6], 6656  }
  0x26   :  { %2672 = vsyncadd [#allocation6], 4294960640  ;;  %v3725_v0 = vmov 0.0   ;;  %vm2683_vm0 = vmmov 0   ;;  %vm72_vm1 = vcmask 261120   ;;  %v64_v1 = vld [vmem:[#allocation5 + $0x18] sm:$0xff] }
  0x27   :  { %2297 = vmatprep.subr.mxu0 %v3725_v0  ;;  %2308 = vmatprep.subr.mxu1 %v3725_v0  ;;  %v63_v2 = vld [vmem:[#allocation5 + $0x10] sm:$0xff]  ;;  %v62_v3 = vld [vmem:[#allocation5 + $0x8] sm:$0xff]  ;;  %v2733_v4 = vand.u32 4294901760, %v64_v1  ;;  %v61_v7 = vld [vmem:[#allocation5] sm:$0xff] }
  0x28   :  { %2305 = vmatprep.mubr.msk.f32.mxu0 %vm2683_vm0, %v3725_v0  ;;  %2316 = vmatprep.mubr.msk.f32.mxu1 %vm2683_vm0, %v3725_v0  ;;  %v2735_v5 = vand.u32 4294901760, %v63_v2  ;;  %v2737_v6 = vand.u32 4294901760, %v62_v3  ;;  %v60_v8 = vld [vmem:[#allocation2] sm:$0xff]  ;;  %v2739_v9 = vand.u32 4294901760, %v61_v7  ;;  %v608_v32 = vld [vmem:[#allocation7 + $0x170] sm:$0xff]  ;;  %v607_v33 = vld [vmem:[#allocation7 + $0x168] sm:$0xff] }
  0x29   :  { %v74_v10 = vsel %vm72_vm1, %v60_v8, 0  ;;  %2298 = vmatpush3.msra.mxu0 %v2733_v4  ;;  %v2743_v11 = vsub.f32 %v64_v1, %v2733_v4  ;;  %v605_v34 = vld [vmem:[#allocation7 + $0x158] sm:$0xff]  ;;  %v2791_v35 = vand.u32 4294901760, %v608_v32  ;;  %v604_v36 = vld [vmem:[#allocation7 + $0x150] sm:$0xff]  ;;  %v2795_v37 = vand.u32 4294901760, %v607_v33  ;;  %v602_v38 = vld [vmem:[#allocation7 + $0x140] sm:$0xff] }
  0x2a   :  { %v2745_v12 = vand.u32 4294901760, %v74_v10  ;;  %v2748_v13 = vsub.f32 %v63_v2, %v2735_v5  ;;  %v2751_v14 = vsub.f32 %v62_v3, %v2737_v6  ;;  %2299 = vmatprep.subr.mxu0 %v3725_v0  ;;  %v2755_v15 = vsub.f32 %v61_v7, %v2739_v9  ;;  %v601_v40 = vld [vmem:[#allocation7 + $0x138] sm:$0xff]  ;;  %v599_v42 = vld [vmem:[#allocation7 + $0x128] sm:$0xff] }
  0x2b   :  { %2300 = vmatpush3.msra.mxu0 %v2735_v5  ;;  %v182_v16 = vand.u32 4294901760, %v2743_v11  ;;  %3782 = vst [vmem:[#allocation12_spill] sm:$0xff] %v2791_v35  ;;  %v2799_v39 = vand.u32 4294901760, %v605_v34  ;;  %v2804_v41 = vand.u32 4294901760, %v604_v36  ;;  %v2809_v43 = vsub.f32 %v608_v32, %v2791_v35 }
  0x2c   :  { %v2760_v17 = vsub.f32 %v74_v10, %v2745_v12  ;;  %v189_v18 = vand.u32 4294901760, %v2748_v13  ;;  %v196_v19 = vand.u32 4294901760, %v2751_v14  ;;  %2301 = vmatprep.subr.mxu0 %v3725_v0  ;;  %v203_v20 = vand.u32 4294901760, %v2755_v15 }
  0x2d   :  { %2302 = vmatpush3.msra.mxu0 %v2737_v6  ;;  %v183_v21 = vsub.f32 %v2743_v11, %v182_v16  ;;  %3783 = vst [vmem:[#allocation13_spill] sm:$0xff] %v2809_v43  ;;  %v2811_v44 = vand.u32 4294901760, %v602_v38  ;;  %v2815_v45 = vsub.f32 %v607_v33, %v2795_v37  ;;  %v2817_v46 = vand.u32 4294901760, %v601_v40 }
  0x2e   :  { %v147_v22 = vand.u32 4294901760, %v2760_v17  ;;  %v190_v23 = vsub.f32 %v2748_v13, %v189_v18  ;;  %v197_v24 = vsub.f32 %v2751_v14, %v196_v19  ;;  %2303 = vmatprep.subr.mxu0 %v3725_v0  ;;  %v204_v28 = vsub.f32 %v2755_v15, %v203_v20 }
  0x2f   :  { %2304 = vmatpush3.msra.mxu0 %v2739_v9  ;;  %v184_v25 = vand.u32 4294901760, %v183_v21  ;;  %v2822_v47 = vsub.f32 %v605_v34, %v2799_v39  ;;  %v2824_v48 = vand.u32 4294901760, %v599_v42  ;;  %v2828_v49 = vsub.f32 %v604_v36, %v2804_v41  ;;  %v592_v21 = vld [vmem:[#allocation7 + $0xf0] sm:$0xff]  ;;  %v587_v34 = vld [vmem:[#allocation7 + $0xc8] sm:$0xff] }
  0x30   :  { %v148_v26 = vsub.f32 %v2760_v17, %v147_v22  ;;  %v191_v27 = vand.u32 4294901760, %v190_v23  ;;  %2319 = vmatprep.subr.mxu0 %v3725_v0  ;;  %v198_v30 = vand.u32 4294901760, %v197_v24  ;;  %v205_v31 = vand.u32 4294901760, %v204_v28 }
  0x31   :  { %2309 = vmatpush3.msra.mxu1 %v184_v25  ;;  %v3724_v50 = vand.u32 4294901760, %v2809_v43  ;;  %v2834_v51 = vsub.f32 %v602_v38, %v2811_v44  ;;  %v3722_v52 = vand.u32 4294901760, %v2815_v45  ;;  %v2841_v53 = vsub.f32 %v601_v40, %v2817_v46  ;;  %v590_v25 = vld [vmem:[#allocation7 + $0xe0] sm:$0xff] }
  0x32   :  { %v149_v29 = vand.u32 4294901760, %v148_v26  ;;  %2310 = vmatprep.subr.mxu1 %v3725_v0  ;;  %v3721_v54 = vand.u32 4294901760, %v2822_v47  ;;  %v2849_v55 = vsub.f32 %v599_v42, %v2824_v48  ;;  %v3719_v56 = vand.u32 4294901760, %v2828_v49 }
  0x33   :  { %2311 = vmatpush3.msra.mxu1 %v191_v27  ;;  %v738_v57 = vsub.f32 %v2809_v43, %v3724_v50  ;;  %v3718_v58 = vand.u32 4294901760, %v2834_v51  ;;  %v744_v59 = vsub.f32 %v2815_v45, %v3722_v52  ;;  %v3717_v60 = vand.u32 4294901760, %v2841_v53  ;;  %v569_v52 = vld [vmem:[#allocation7 + $0x38] sm:$0xff] }
  0x34   :  { %2306 = vmatmul.mubr.f32.vlgmr.msra.gmra.mxu0 %v149_v29  ;;  %2312 = vmatprep.subr.mxu1 %v3725_v0  ;;  %v750_v61 = vsub.f32 %v2822_v47, %v3721_v54  ;;  %v3715_v62 = vand.u32 4294901760, %v2849_v55  ;;  %v756_v63 = vsub.f32 %v2828_v49, %v3719_v56  ;;  %v2922_v24 = vand.u32 4294901760, %v592_v21  ;;  %v589_v29 = vld [vmem:[#allocation7 + $0xd8] sm:$0xff]  ;;  %v571_v56 = vld [vmem:[#allocation7 + $0x48] sm:$0xff] }
  0x35   :  { %2320 = vmatpush3.msra.mxu0 %v2743_v11  ;;  %2313 = vmatpush3.msra.mxu1 %v198_v30  ;;  %v739_v1 = vand.u32 4294901760, %v738_v57  ;;  %v762_v2 = vsub.f32 %v2834_v51, %v3718_v58  ;;  %v745_v3 = vand.u32 4294901760, %v744_v59  ;;  %v2929_v28 = vand.u32 4294901760, %v590_v25  ;;  %v586_v57 = vld [vmem:[#allocation7 + $0xc0] sm:$0xff] }
  0x36   :  { %2321 = vmatprep.subr.mxu0 %v3725_v0  ;;  %2314 = vmatprep.subr.mxu1 %v3725_v0  ;;  %v774_v7 = vsub.f32 %v2849_v55, %v3715_v62  ;;  %v757_v8 = vand.u32 4294901760, %v756_v63  ;;  %v2937_v32 = vsub.f32 %v592_v21, %v2922_v24  ;;  %v2939_v33 = vand.u32 4294901760, %v589_v29 }
  0x37   :  { %2322 = vmatpush3.msra.mxu0 %v2748_v13  ;;  %2315 = vmatpush3.msra.mxu1 %v205_v31  ;;  %v596_v13 = vld [vmem:[#allocation7 + $0x110] sm:$0xff]  ;;  %v2947_v40 = vsub.f32 %v590_v25, %v2929_v28  ;;  %v2949_v42 = vand.u32 4294901760, %v587_v34 }
  0x38   :  { %2323 = vmatprep.subr.mxu0 %v3725_v0  ;;  %2317 = vmatmul.mubr.f32.vlgmr.msra.gmra.mxu1 %v2745_v12  ;;  %v775_v11 = vand.u32 4294901760, %v774_v7  ;;  %v3708_v63 = vand.u32 4294901760, %v2937_v32 }
  0x39   :  { %2324 = vmatpush3.msra.mxu0 %v2751_v14  ;;  %2330 = vmatprep.subr.mxu1 %v3725_v0  ;;  %v2904_v14 = vand.u32 4294901760, %v596_v13  ;;  %v2965_v7 = vsub.f32 %v587_v34, %v2949_v42 }
  0x3a   :  { %2325 = vmatprep.subr.mxu0 %v3725_v0  ;;  %2331 = vmatpush3.msra.mxu1 %v2733_v4 }
  0x3b   :  { %2326 = vmatpush3.msra.mxu0 %v2755_v15  ;;  %2327 = vmatprep.mubr.msk.f32.mxu0 %vm2683_vm0, %v3725_v0  ;;  %v595_v15 = vld [vmem:[#allocation7 + $0x108] sm:$0xff]  ;;  %v3709_v21 = vand.u32 4294901760, %v2965_v7 }
  0x3c   :  { %2332 = vmatprep.subr.mxu1 %v3725_v0  ;;  %2341 = vmatprep.subr.mxu0 %v3725_v0 }
  0x3d   :  { %2328 = vmatmul.mubr.f32.vlgmr.msra.gmra.mxu0 %v2760_v17  ;;  %2333 = vmatpush3.msra.mxu1 %v2735_v5  ;;  %v2909_v17 = vand.u32 4294901760, %v595_v15 }
  0x3e   :  { %2342 = vmatpush3.msra.mxu0 %v182_v16  ;;  %2334 = vmatprep.subr.mxu1 %v3725_v0 }
  0x3f   :  { %2343 = vmatprep.subr.mxu0 %v3725_v0  ;;  %2335 = vmatpush3.msra.mxu1 %v2737_v6  ;;  %v2920_v23 = vsub.f32 %v595_v15, %v2909_v17 }
  0x40   :  { %2344 = vmatpush3.msra.mxu0 %v189_v18  ;;  %2336 = vmatprep.subr.mxu1 %v3725_v0  ;;  %v593_v18 = vld [vmem:[#allocation7 + $0xf8] sm:$0xff] }
  0x41   :  { %2345 = vmatprep.subr.mxu0 %v3725_v0  ;;  %2337 = vmatpush3.msra.mxu1 %v2739_v9  ;;  %v3711_v31 = vand.u32 4294901760, %v2920_v23 }
  0x42   :  { %2338 = vmatprep.mubr.msk.f32.mxu1 %vm2683_vm0, %v3725_v0  ;;  %2346 = vmatpush3.msra.mxu0 %v196_v19  ;;  %v2913_v19 = vsub.f32 %v596_v13, %v2904_v14  ;;  %v581_v13 = vld [vmem:[#allocation7 + $0x98] sm:$0xff] }
  0x43   :  { %2339 = vmatmul.mubr.f32.vlgmr.msra.gmra.mxu1 %v147_v22  ;;  %2347 = vmatprep.subr.mxu0 %v3725_v0 }
  0x44   :  { %2352 = vmatprep.subr.mxu1 %v3725_v0  ;;  %2348 = vmatpush3.msra.mxu0 %v203_v20  ;;  %v2915_v20 = vand.u32 4294901760, %v593_v18  ;;  %v3713_v26 = vand.u32 4294901760, %v2913_v19 }
  0x45   :  { %2349 = vmatprep.mubr.msk.f32.mxu0 %vm2683_vm0, %v3725_v0  ;;  %2353 = vmatpush3.msra.mxu1 %v2733_v4  ;;  %v768_v4 = vsub.f32 %v2841_v53, %v3717_v60 }
  0x46   :  { %2350 = vmatmul.mubr.f32.vlgmr.msra.gmra.mxu0 %v2745_v12  ;;  %2354 = vmatprep.subr.mxu1 %v3725_v0  ;;  %v2927_v27 = vsub.f32 %v593_v18, %v2915_v20  ;;  %v786_v36 = vsub.f32 %v2913_v19, %v3713_v26  ;;  %v574_v26 = vld [vmem:[#allocation7 + $0x60] sm:$0xff] }
  0x47   :  { %2360 = vmatprep.mubr.msk.f32.mxu1 %vm2683_vm0, %v3725_v0  ;;  %2355 = vmatpush3.msra.mxu1 %v2735_v5  ;;  %v751_v5 = vand.u32 4294901760, %v750_v61  ;;  %v769_v10 = vand.u32 4294901760, %v768_v4  ;;  %v792_v61 = vsub.f32 %v2920_v23, %v3711_v31  ;;  %v3052_v54 = vand.u32 4294901760, %v574_v26 }
  0x48   :  { %628 = vmatprep.subr.mxu0 %v2791_v35  ;;  %2356 = vmatprep.subr.mxu1 %v3725_v0  ;;  %v3710_v38 = vand.u32 4294901760, %v2927_v27 }
  0x49   :  { %630 = vmatpush1.msra.mxu0 %v2795_v37  ;;  %2357 = vmatpush3.msra.mxu1 %v2737_v6  ;;  %v763_v6 = vand.u32 4294901760, %v762_v2  ;;  %v584_v2 = vld [vmem:[#allocation7 + $0xb0] sm:$0xff] }
  0x4a   :  { %632 = vmatprep.subr.mxu0 %v2799_v39  ;;  %2358 = vmatprep.subr.mxu1 %v3725_v0  ;;  %v798_v4 = vsub.f32 %v2927_v27, %v3710_v38  ;;  %v2978_v25 = vand.u32 4294901760, %v584_v2 }
  0x4b   :  { %634 = vmatpush1.msra.mxu0 %v2804_v41  ;;  %2359 = vmatpush3.msra.mxu1 %v2739_v9  ;;  %v598_v9 = vld [vmem:[#allocation7 + $0x120] sm:$0xff] }
  0x4c   :  { %636 = vmatprep.subr.mxu0 %v2811_v44  ;;  %2361 = vmatmul.mubr.f32.vlgmr.msra.gmra.mxu1 %v2745_v12  ;;  %v2902_v12 = vand.u32 4294901760, %v598_v9  ;;  %v799_v15 = vand.u32 4294901760, %v798_v4  ;;  %v822_v4 = vsub.f32 %v2965_v7, %v3709_v21 }
  0x4d   :  { %740 = vmatprep.subr.mxu1 %v739_v1  ;;  %638 = vmatpush1.msra.mxu0 %v2817_v46  ;;  %v2957_v1 = vsub.f32 %v589_v29, %v2939_v33  ;;  %v580_v29 = vld [vmem:[#allocation7 + $0x90] sm:$0xff] }
  0x4e   :  { %746 = vmatpush1.msra.mxu1 %v745_v3  ;;  %640 = vmatprep.subr.mxu0 %v2824_v48  ;;  %v2907_v16 = vsub.f32 %v598_v9, %v2902_v12  ;;  %v787_v3 = vand.u32 4294901760, %v786_v36  ;;  %v2972_v9 = vand.u32 4294901760, %v586_v57 }
  0x4f   :  { %752 = vmatprep.subr.mxu1 %v751_v5  ;;  %959 = vmatprep.mubr.f32.mxu1 %v3725_v0  ;;  %v3707_v5 = vand.u32 4294901760, %v2947_v40 }
  0x50   :  { %758 = vmatpush1.msra.mxu1 %v757_v8  ;;  %723 = vmatprep.mubr.f32.mxu0 %v3725_v0  ;;  %v3714_v22 = vand.u32 4294901760, %v2907_v16  ;;  %v583_v8 = vld [vmem:[#allocation7 + $0xa8] sm:$0xff]  ;;  %v2984_v36 = vsub.f32 %v586_v57, %v2972_v9 }
  0x51   :  { %764 = vmatprep.subr.mxu1 %v763_v6  ;;  %642 = vmatpush1.msra.mxu0 %v2902_v12  ;;  %v793_v6 = vand.u32 4294901760, %v792_v61  ;;  %v810_v18 = vsub.f32 %v2947_v40, %v3707_v5  ;;  %v578_v61 = vld [vmem:[#allocation7 + $0x80] sm:$0xff] }
  0x52   :  { %770 = vmatpush1.msra.mxu1 %v769_v10  ;;  %644 = vmatprep.subr.mxu0 %v2904_v14  ;;  %v780_v30 = vsub.f32 %v2907_v16, %v3714_v22  ;;  %v804_v10 = vsub.f32 %v2937_v32, %v3708_v63  ;;  %v3712_v5 = vand.u32 4294901760, %v2984_v36  ;;  %v3009_v31 = vand.u32 4294901760, %v578_v61 }
  0x53   :  { %776 = vmatprep.subr.mxu1 %v775_v11  ;;  %646 = vmatpush1.msra.mxu0 %v2909_v17  ;;  %v3706_v11 = vand.u32 4294901760, %v2957_v1 }
  0x54   :  { %648 = vmatprep.subr.mxu0 %v2915_v20  ;;  %v781_v59 = vand.u32 4294901760, %v780_v30  ;;  %v805_v30 = vand.u32 4294901760, %v804_v10  ;;  %v2995_v10 = vand.u32 4294901760, %v581_v13 }
  0x55   :  { %650 = vmatpush1.msra.mxu0 %v2922_v24  ;;  %v816_v34 = vsub.f32 %v2957_v1, %v3706_v11  ;;  %v577_v11 = vld [vmem:[#allocation7 + $0x78] sm:$0xff] }
  0x56   :  { %652 = vmatprep.subr.mxu0 %v2929_v28  ;;  %782 = vmatpush1.msra.mxu1 %v781_v59  ;;  %v2986_v59 = vand.u32 4294901760, %v583_v8  ;;  %v3007_v38 = vsub.f32 %v581_v13, %v2995_v10 }
  0x57   :  { %654 = vmatpush1.msra.mxu0 %v2939_v33  ;;  %788 = vmatprep.subr.mxu1 %v787_v3  ;;  %v811_v3 = vand.u32 4294901760, %v810_v18  ;;  %v817_v57 = vand.u32 4294901760, %v816_v34  ;;  %v575_v18 = vld [vmem:[#allocation7 + $0x68] sm:$0xff] }
  0x58   :  { %656 = vmatprep.subr.mxu0 %v2949_v42  ;;  %794 = vmatpush1.msra.mxu1 %v793_v6  ;;  %v2993_v6 = vsub.f32 %v584_v2, %v2978_v25  ;;  %v3000_v63 = vsub.f32 %v583_v8, %v2986_v59  ;;  %v823_v2 = vand.u32 4294901760, %v822_v4  ;;  %3785 = vst [vmem:[#allocation15_spill] sm:$0xff] %v3007_v38  ;;  %v3723_v4 = vand.u32 4294901760, %v3007_v38 }
  0x59   :  { %658 = vmatpush1.msra.mxu0 %v2972_v9  ;;  %800 = vmatprep.subr.mxu1 %v799_v15  ;;  %v3002_v15 = vand.u32 4294901760, %v580_v29  ;;  %v828_v8 = vsub.f32 %v2984_v36, %v3712_v5  ;;  %v3029_v5 = vand.u32 4294901760, %v575_v18 }
  0x5a   :  { %660 = vmatprep.subr.mxu0 %v2978_v25  ;;  %806 = vmatpush1.msra.mxu1 %v805_v30  ;;  %3784 = vst [vmem:[#allocation14_spill] sm:$0xff] %v3000_v63  ;;  %v3716_v21 = vand.u32 4294901760, %v2993_v6  ;;  %v3720_v30 = vand.u32 4294901760, %v3000_v63  ;;  %v846_v60 = vsub.f32 %v3007_v38, %v3723_v4 }
  0x5b   :  { %662 = vmatpush1.msra.mxu0 %v2986_v59  ;;  %812 = vmatprep.subr.mxu1 %v811_v3  ;;  %v3017_v34 = vsub.f32 %v580_v29, %v3002_v15  ;;  %v3019_v3 = vand.u32 4294901760, %v577_v11  ;;  %v829_v29 = vand.u32 4294901760, %v828_v8  ;;  %v3045_v8 = vsub.f32 %v575_v18, %v3029_v5 }
  0x5c   :  { %664 = vmatprep.subr.mxu0 %v2995_v10  ;;  %818 = vmatpush1.msra.mxu1 %v817_v57  ;;  %v834_v13 = vsub.f32 %v2993_v6, %v3716_v21  ;;  %v3027_v57 = vsub.f32 %v578_v61, %v3009_v31  ;;  %v840_v22 = vsub.f32 %v3000_v63, %v3720_v30  ;;  %v572_v21 = vld [vmem:[#allocation7 + $0x50] sm:$0xff]  ;;  %v847_v4 = vand.u32 4294901760, %v846_v60  ;;  %v566_v60 = vld [vmem:[#allocation7 + $0x20] sm:$0xff] }
  0x5d   :  { %3786 = vst [vmem:[#allocation16_spill] sm:$0xff] %v3017_v34  ;;  %666 = vmatpush1.msra.mxu0 %v3002_v15  ;;  %824 = vmatprep.subr.mxu1 %v823_v2  ;;  %v3727_v2 = vand.u32 4294901760, %v3017_v34  ;;  %v3037_v62 = vsub.f32 %v577_v11, %v3019_v3  ;;  %3789 = vst [vmem:[#allocation19_spill] sm:$0xff] %v3045_v8  ;;  %v3738_v50 = vand.u32 4294901760, %v3045_v8  ;;  %v3058_v0 = vand.u32 4294901760, %v572_v21 }
  0x5e   :  { %3787 = vst [vmem:[#allocation17_spill] sm:$0xff] %v3027_v57  ;;  %668 = vmatprep.subr.mxu0 %v3009_v31  ;;  %v835_v61 = vand.u32 4294901760, %v834_v13  ;;  %v3730_v58 = vand.u32 4294901760, %v3027_v57  ;;  %830 = vmatpush1.msra.mxu1 %v829_v29  ;;  %v841_v30 = vand.u32 4294901760, %v840_v22  ;;  %v568_v22 = vld [vmem:[#allocation7 + $0x30] sm:$0xff]  ;;  %v3089_v63 = vand.u32 4294901760, %v566_v60 }
  0x5f   :  { %3788 = vst [vmem:[#allocation18_spill] sm:$0xff] %v3037_v62  ;;  %670 = vmatpush1.msra.mxu0 %v3019_v3  ;;  %v852_v11 = vsub.f32 %v3017_v34, %v3727_v2  ;;  %v3733_v13 = vand.u32 4294901760, %v3037_v62  ;;  %v3064_v34 = vsub.f32 %v574_v26, %v3052_v54 }
  0x60   :  { %672 = vmatprep.subr.mxu0 %v3029_v5  ;;  %836 = vmatprep.subr.mxu1 %v835_v61  ;;  %v858_v18 = vsub.f32 %v3027_v57, %v3730_v58  ;;  %v3066_v61 = vand.u32 4294901760, %v571_v56  ;;  %v870_v57 = vsub.f32 %v3045_v8, %v3738_v50 }
  0x61   :  { %842 = vmatpush1.msra.mxu1 %v841_v30  ;;  %v853_v29 = vand.u32 4294901760, %v852_v11  ;;  %v864_v2 = vsub.f32 %v3037_v62, %v3733_v13  ;;  %3790 = vst [vmem:[#allocation20_spill] sm:$0xff] %v3064_v34  ;;  %674 = vmatpush1.msra.mxu0 %v3052_v54  ;;  %v3073_v30 = vsub.f32 %v572_v21, %v3058_v0  ;;  %v3075_v11 = vand.u32 4294901760, %v569_v52  ;;  %v565_v13 = vld [vmem:[#allocation7 + $0x18] sm:$0xff] }
  0x62   :  { %848 = vmatprep.subr.mxu1 %v847_v4  ;;  %v859_v58 = vand.u32 4294901760, %v858_v18  ;;  %676 = vmatprep.subr.mxu0 %v3058_v0  ;;  %v3743_v62 = vand.u32 4294901760, %v3064_v34  ;;  %v3080_v38 = vsub.f32 %v571_v56, %v3066_v61  ;;  %v3082_v4 = vand.u32 4294901760, %v568_v22  ;;  %v563_v18 = vld [vmem:[#allocation7 + $0x8] sm:$0xff] }
  0x63   :  { %3791 = vst [vmem:[#allocation21_spill] sm:$0xff] %v3073_v30  ;;  %3792 = vst [vmem:[#allocation22_spill] sm:$0xff] %v3075_v11  ;;  %854 = vmatpush1.msra.mxu1 %v853_v29  ;;  %v865_v26 = vand.u32 4294901760, %v864_v2  ;;  %678 = vmatpush1.msra.mxu0 %v3066_v61  ;;  %v871_v21 = vand.u32 4294901760, %v870_v57  ;;  %v3750_v50 = vand.u32 4294901760, %v3073_v30  ;;  %v3087_v8 = vsub.f32 %v569_v52, %v3075_v11  ;;  %v562_v2 = vld [vmem:[#allocation7] sm:$0xff] }
  0x64   :  { %3793 = vst [vmem:[#allocation23_spill] sm:$0xff] %v3080_v38  ;;  %3794 = vst [vmem:[#allocation24_spill] sm:$0xff] %v3082_v4  ;;  %860 = vmatprep.subr.mxu1 %v859_v58  ;;  %680 = vmatprep.subr.mxu0 %v3075_v11  ;;  %v876_v56 = vsub.f32 %v3064_v34, %v3743_v62  ;;  %v3097_v29 = vsub.f32 %v568_v22, %v3082_v4  ;;  %v3099_v58 = vand.u32 4294901760, %v565_v13 }
  0x65   :  { %3795 = vst [vmem:[#allocation25_spill] sm:$0xff] %v3087_v8  ;;  %866 = vmatpush1.msra.mxu1 %v865_v26  ;;  %682 = vmatpush1.msra.mxu0 %v3082_v4  ;;  %v882_v52 = vsub.f32 %v3073_v30, %v3750_v50  ;;  %v3757_v57 = vand.u32 4294901760, %v3087_v8  ;;  %v3107_v26 = vsub.f32 %v566_v60, %v3089_v63  ;;  %v3109_v62 = vand.u32 4294901760, %v563_v18 }
  0x66   :  { %3796 = vst [vmem:[#allocation26_spill] sm:$0xff] %v3097_v29  ;;  %3797 = vst [vmem:[#allocation27_spill] sm:$0xff] %v3099_v58  ;;  %872 = vmatprep.subr.mxu1 %v871_v21  ;;  %684 = vmatprep.subr.mxu0 %v3089_v63  ;;  %v877_v22 = vand.u32 4294901760, %v876_v56  ;;  %v3799_v34 = vand.u32 4294901760, %v3080_v38  ;;  %v3763_v21 = vand.u32 4294901760, %v3097_v29  ;;  %v3117_v11 = vsub.f32 %v565_v13, %v3099_v58 }
  0x67   :  { %3798 = vst [vmem:[#allocation28_spill] sm:$0xff] %v3107_v26  ;;  %686 = vmatpush1.msra.mxu0 %v3099_v58  ;;  %v883_v50 = vand.u32 4294901760, %v882_v52  ;;  %v894_v60 = vsub.f32 %v3087_v8, %v3757_v57  ;;  %v3760_v30 = vand.u32 4294901760, %v3107_v26  ;;  %v3125_v56 = vsub.f32 %v563_v18, %v3109_v62 }
  0x68   :  { %v888_v4 = vsub.f32 %v3080_v38, %v3799_v34  ;;  %3800 = vst [vmem:[#allocation29_spill] sm:$0xff] %v3117_v11  ;;  %688 = vmatprep.subr.mxu0 %v3109_v62  ;;  %878 = vmatpush1.msra.mxu1 %v877_v22  ;;  %v900_v13 = vsub.f32 %v3097_v29, %v3763_v21  ;;  %v3762_v38 = vand.u32 4294901760, %v3117_v11  ;;  %v3132_v52 = vand.u32 4294901760, %v562_v2 }
  0x69   :  { %3801 = vst [vmem:[#allocation30_spill] sm:$0xff] %v3125_v56  ;;  %884 = vmatprep.subr.mxu1 %v883_v50  ;;  %v895_v58 = vand.u32 4294901760, %v894_v60  ;;  %v906_v57 = vsub.f32 %v3107_v26, %v3760_v30  ;;  %v3761_v18 = vand.u32 4294901760, %v3125_v56 }
  0x6a   :  { %v889_v34 = vand.u32 4294901760, %v888_v4  ;;  %3802 = vst [vmem:[#allocation31_spill] sm:$0xff] %v3132_v52  ;;  %v901_v8 = vand.u32 4294901760, %v900_v13  ;;  %v912_v4 = vsub.f32 %v3117_v11, %v3762_v38  ;;  %v3142_v22 = vsub.f32 %v562_v2, %v3132_v52  ;;  %690 = vmatpush1.msra.mxu0 %v3132_v52 }
  0x6b   :  { %v907_v50 = vand.u32 4294901760, %v906_v57  ;;  %v918_v60 = vsub.f32 %v3125_v56, %v3761_v18  ;;  %969 = vmatprep.subr.mxu0 %v2809_v43 }
  0x6c   :  { %890 = vmatpush1.msra.mxu1 %v889_v34  ;;  %3803 = vst [vmem:[#allocation32_spill] sm:$0xff] %v3142_v22  ;;  %v913_v34 = vand.u32 4294901760, %v912_v4  ;;  %v3767_v13 = vand.u32 4294901760, %v3142_v22 }
  0x6d   :  { %896 = vmatprep.subr.mxu1 %v895_v58  ;;  %v919_v30 = vand.u32 4294901760, %v918_v60 }
  0x6e   :  { %902 = vmatpush1.msra.mxu1 %v901_v8  ;;  %v924_v2 = vsub.f32 %v3142_v22, %v3767_v13  ;;  %v2164_v8 = vld [vmem:[%s3702_s2] ss:$0 sm:$0xff] }
  0x6f   :  { %908 = vmatprep.subr.mxu1 %v907_v50 }
  0x70   :  { %914 = vmatpush1.msra.mxu1 %v913_v34  ;;  %v925_v58 = vand.u32 4294901760, %v924_v2 }
  0x71   :  { %920 = vmatprep.subr.mxu1 %v919_v30 }
  0x72   :  { %926 = vmatpush1.msra.mxu1 %v925_v58 }
  0x73   :  { %1105 = vmatprep.subr.mxu1 %v2791_v35 }
  0xf4   :  { %v151_v57 = vpop.f32.mrf.mxu0 }
  0xf5   :  { %v152_v60 = vadd.f32 %v2164_v8, %v151_v57  ;;  %v3812_v57 = vld [vmem:[#allocation17_spill] sm:$0xff]  ;;  %v3813_v8 = vld [vmem:[#allocation18_spill] sm:$0xff] }
  0xf6   :  { %v2307_v18 = vpop.f32.mrf.mxu0 }
  0xf8   :  { %v242_v38 = vpop.f32.mrf.mxu1 }
  0xf9   :  { %v243_v21 = vadd.f32 %v242_v38, %v152_v60  ;;  %v3805_v38 = vmov 0.0   ;;  %v3816_v60 = vld [vmem:[#allocation20_spill] sm:$0xff] }
  0xfa   :  { %v2318_v4 = vpop.f32.mrf.mxu1 }
  0xfb   :  { %v3814_v4 = vld [vmem:[#allocation27_spill] sm:$0xff] }
  0xfd   :  { %v322_v50 = vpop.f32.mrf.mxu0 }
  0xfe   :  { %v323_v13 = vadd.f32 %v322_v50, %v243_v21  ;;  %v3815_v50 = vld [vmem:[#allocation19_spill] sm:$0xff] }
  0xff   :  { %v2329_v34 = vpop.f32.mrf.mxu0 }
 0x100   :  { %v3817_v34 = vld [vmem:[#allocation31_spill] sm:$0xff] }
 0x103   :  { %v399_v43 = vpop.f32.mrf.mxu1 }
 0x104   :  { %v400_v2 = vadd.f32 %v399_v43, %v323_v13  ;;  %v3811_v13 = vld [vmem:[#allocation24_spill] sm:$0xff] }
 0x105   :  { %v2340_v56 = vpop.f32.mrf.mxu1 }
 0x106   :  { %v482_v30 = vpop.f32.mrf.mxu0  ;;  %v3809_v56 = vld [vmem:[#allocation22_spill] sm:$0xff] }
 0x107   :  { %v483_v22 = vadd.f32 %v482_v30, %v400_v2  ;;  %v3818_v30 = vld [vmem:[#allocation21_spill] sm:$0xff]  ;;  %v3819_v2 = vld [vmem:[#allocation12_spill] sm:$0xff] }
 0x108   :  { %v2351_v58 = vpop.f32.mrf.mxu0 }
 0x109   :  { %v3820_v58 = vld [vmem:[#allocation23_spill] sm:$0xff] }
 0x10c   :  { %v557_v11 = vpop.f32.mrf.mxu1 }
 0x10d   :  { %v558_v26 = vadd.f32 %v557_v11, %v483_v22  ;;  %v3810_v22 = vld [vmem:[#allocation16_spill] sm:$0xff] }
 0x10e   :  { %v2362_v18 = vpop.f32.mrf.mxu1 }
 0x10f   :  { %v561_v29 = vmax.f32 %v558_v26, 0.0  ;;  %v3808_v26 = vld [vmem:[#allocation15_spill] sm:$0xff]  ;;  %v3821_v18 = vld [vmem:[#allocation25_spill] sm:$0xff] }
 0x111   :  { %v3157_v35 = vand.u32 4294901760, %v561_v29 }
 0x113   :  { %3804 = vst [vmem:[#allocation33_spill] sm:$0xff] %v3157_v35  ;;  %v3160_v52 = vsub.f32 %v561_v29, %v3157_v35  ;;  %961 = vmatmul.mubr.f32.vlgmr.msra.gmra.mxu1 %v3157_v35  ;;  %v3807_v29 = vld [vmem:[#allocation14_spill] sm:$0xff]  ;;  %v3824_v35 = vld [vmem:[#allocation29_spill] sm:$0xff] }
 0x114   :  { %1107 = vmatpush1.msra.mxu1 %v2795_v37  ;;  %1200 = vmatprep.mubr.f32.mxu1 %v3805_v38 }
 0x115   :  { %v3166_v21 = vand.u32 4294901760, %v3160_v52  ;;  %1109 = vmatprep.subr.mxu1 %v2799_v39 }
 0x116   :  { %1111 = vmatpush1.msra.mxu1 %v2804_v41 }
 0x117   :  { %1113 = vmatprep.subr.mxu1 %v2811_v44  ;;  %v727_v43 = vsub.f32 %v3160_v52, %v3166_v21 }
 0x118   :  { %1115 = vmatpush1.msra.mxu1 %v2817_v46 }
 0x119   :  { %1117 = vmatprep.subr.mxu1 %v2824_v48  ;;  %v3175_v11 = vand.u32 4294901760, %v727_v43  ;;  %v3822_v43 = vld [vmem:[#allocation26_spill] sm:$0xff] }
 0x11a   :  { %1119 = vmatpush1.msra.mxu1 %v2902_v12 }
 0x11b   :  { %3806 = vst [vmem:[#allocation34_spill] sm:$0xff] %v3175_v11  ;;  %1121 = vmatprep.subr.mxu1 %v2904_v14  ;;  %729 = vmatmul.mubr.f32.vlgmr.msra.gmra.mxu0 %v3175_v11  ;;  %v3823_v11 = vld [vmem:[#allocation28_spill] sm:$0xff] }
 0x11c   :  { %972 = vmatpush1.msra.mxu0 %v2815_v45  ;;  %1123 = vmatpush1.msra.mxu1 %v2909_v17 }
 0x11d   :  { %975 = vmatprep.subr.mxu0 %v2822_v47  ;;  %1125 = vmatprep.subr.mxu1 %v2915_v20 }
 0x11e   :  { %978 = vmatpush1.msra.mxu0 %v2828_v49  ;;  %1127 = vmatpush1.msra.mxu1 %v2922_v24 }
 0x11f   :  { %981 = vmatprep.subr.mxu0 %v2834_v51  ;;  %1129 = vmatprep.subr.mxu1 %v2929_v28 }
 0x120   :  { %984 = vmatpush1.msra.mxu0 %v2841_v53  ;;  %1131 = vmatpush1.msra.mxu1 %v2939_v33 }
 0x121   :  { %987 = vmatprep.subr.mxu0 %v2849_v55  ;;  %1133 = vmatprep.subr.mxu1 %v2949_v42 }
 0x122   :  { %990 = vmatpush1.msra.mxu0 %v2907_v16  ;;  %1135 = vmatpush1.msra.mxu1 %v2972_v9 }
 0x123   :  { %993 = vmatprep.subr.mxu0 %v2913_v19  ;;  %1137 = vmatprep.subr.mxu1 %v2978_v25 }
 0x124   :  { %996 = vmatpush1.msra.mxu0 %v2920_v23  ;;  %1139 = vmatpush1.msra.mxu1 %v2986_v59 }
 0x125   :  { %999 = vmatprep.subr.mxu0 %v2927_v27  ;;  %1141 = vmatprep.subr.mxu1 %v2995_v10 }
 0x126   :  { %1002 = vmatpush1.msra.mxu0 %v2937_v32  ;;  %1143 = vmatpush1.msra.mxu1 %v3002_v15 }
 0x127   :  { %1005 = vmatprep.subr.mxu0 %v2947_v40  ;;  %1145 = vmatprep.subr.mxu1 %v3009_v31 }
 0x128   :  { %1008 = vmatpush1.msra.mxu0 %v2957_v1  ;;  %1147 = vmatpush1.msra.mxu1 %v3019_v3 }
 0x129   :  { %1011 = vmatprep.subr.mxu0 %v2965_v7  ;;  %1149 = vmatprep.subr.mxu1 %v3029_v5 }
 0x12a   :  { %1014 = vmatpush1.msra.mxu0 %v2984_v36  ;;  %1151 = vmatpush1.msra.mxu1 %v3052_v54 }
 0x12b   :  { %1017 = vmatprep.subr.mxu0 %v2993_v6  ;;  %1153 = vmatprep.subr.mxu1 %v3058_v0 }
 0x12c   :  { %1020 = vmatpush1.msra.mxu0 %v3807_v29  ;;  %1155 = vmatpush1.msra.mxu1 %v3066_v61 }
 0x12d   :  { %1023 = vmatprep.subr.mxu0 %v3808_v26  ;;  %1157 = vmatprep.subr.mxu1 %v3809_v56 }
 0x12e   :  { %1026 = vmatpush1.msra.mxu0 %v3810_v22  ;;  %1159 = vmatpush1.msra.mxu1 %v3811_v13 }
 0x12f   :  { %1029 = vmatprep.subr.mxu0 %v3812_v57  ;;  %1161 = vmatprep.subr.mxu1 %v3089_v63 }
 0x130   :  { %1032 = vmatpush1.msra.mxu0 %v3813_v8  ;;  %1163 = vmatpush1.msra.mxu1 %v3814_v4 }
 0x131   :  { %1035 = vmatprep.subr.mxu0 %v3815_v50  ;;  %1165 = vmatprep.subr.mxu1 %v3109_v62 }
 0x132   :  { %1038 = vmatpush1.msra.mxu0 %v3816_v60  ;;  %1167 = vmatpush1.msra.mxu1 %v3817_v34 }
 0x133   :  { %1041 = vmatprep.subr.mxu0 %v3818_v30  ;;  %1204 = vmatmul.mubr.f32.vlgmr.msra.gmra.mxu1 %v3166_v21 }
 0x134   :  { %1379 = vmatprep.subr.mxu1 %v3819_v2  ;;  %1044 = vmatpush1.msra.mxu0 %v3820_v58  ;;  %v3825_v2 = vld [vmem:[#allocation30_spill] sm:$0xff] }
 0x135   :  { %1381 = vmatpush1.msra.mxu1 %v2795_v37  ;;  %1047 = vmatprep.subr.mxu0 %v3821_v18  ;;  %v3826_v37 = vld [vmem:[#allocation32_spill] sm:$0xff] }
 0x136   :  { %1383 = vmatprep.subr.mxu1 %v2799_v39  ;;  %1050 = vmatpush1.msra.mxu0 %v3822_v43  ;;  %v3827_v39 = vld [vmem:[#allocation13_spill] sm:$0xff] }
 0x137   :  { %1385 = vmatpush1.msra.mxu1 %v2804_v41  ;;  %1053 = vmatprep.subr.mxu0 %v3823_v11  ;;  %v3828_v41 = vand.u32 4294901760, %v3827_v39  ;;  %v609_v39 = vld [vmem:[#allocation7 + $0x178] sm:$0xff] }
 0x138   :  { %1387 = vmatprep.subr.mxu1 %v2811_v44  ;;  %1056 = vmatpush1.msra.mxu0 %v3824_v35  ;;  %v3829_v44 = vand.u32 4294901760, %v2815_v45  ;;  %v3833_v45 = vand.u32 4294901760, %v2841_v53  ;;  %v603_v53 = vld [vmem:[#allocation7 + $0x148] sm:$0xff] }
 0x139   :  { %1389 = vmatpush1.msra.mxu1 %v2817_v46  ;;  %1059 = vmatprep.subr.mxu0 %v3825_v2  ;;  %v3830_v46 = vand.u32 4294901760, %v2822_v47  ;;  %v3834_v47 = vand.u32 4294901760, %v2849_v55 }
 0x13a   :  { %1391 = vmatprep.subr.mxu1 %v2824_v48  ;;  %1062 = vmatpush1.msra.mxu0 %v3826_v37  ;;  %v3831_v48 = vand.u32 4294901760, %v2828_v49  ;;  %v3835_v49 = vand.u32 4294901760, %v2907_v16  ;;  %v3838_v16 = vand.u32 4294901760, %v2927_v27  ;;  %v3841_v27 = vand.u32 4294901760, %v2957_v1 }
 0x13b   :  { %1095 = vmatprep.mubr.f32.mxu0 %v3805_v38  ;;  %1393 = vmatpush1.msra.mxu1 %v2902_v12  ;;  %v3832_v12 = vand.u32 4294901760, %v2834_v51  ;;  %v3836_v51 = vand.u32 4294901760, %v2913_v19 }
 0x13c   :  { %1098 = vmatmul.mubr.f32.vlgmr.msra.gmra.mxu0 %v3160_v52  ;;  %1213 = vmatprep.subr.mxu0 %v3828_v41  ;;  %v588_v41 = vld [vmem:[#allocation7 + $0xd0] sm:$0xff] }
 0x13d   :  { %1395 = vmatprep.subr.mxu1 %v2904_v14  ;;  %1217 = vmatpush1.msra.mxu0 %v3829_v44  ;;  %v606_v14 = vld [vmem:[#allocation7 + $0x160] sm:$0xff] }
 0x13e   :  { %1397 = vmatpush1.msra.mxu1 %v2909_v17  ;;  %1221 = vmatprep.subr.mxu0 %v3830_v46  ;;  %v3268_v17 = vand.u32 4294901760, %v609_v39  ;;  %v3276_v55 = vand.u32 4294901760, %v606_v14 }
 0x13f   :  { %1399 = vmatprep.subr.mxu1 %v2915_v20  ;;  %1225 = vmatpush1.msra.mxu0 %v3831_v48  ;;  %v3837_v20 = vand.u32 4294901760, %v2920_v23  ;;  %v3840_v23 = vand.u32 4294901760, %v2947_v40  ;;  %v3843_v40 = vand.u32 4294901760, %v2984_v36 }
 0x140   :  { %1401 = vmatpush1.msra.mxu1 %v2922_v24  ;;  %1229 = vmatprep.subr.mxu0 %v3832_v12  ;;  %v600_v24 = vld [vmem:[#allocation7 + $0x130] sm:$0xff]  ;;  %v3285_v19 = vsub.f32 %v609_v39, %v3268_v17  ;;  %v3349_v12 = vand.u32 4294901760, %v588_v41 }
 0x141   :  { %1403 = vmatprep.subr.mxu1 %v2929_v28  ;;  %1233 = vmatpush1.msra.mxu0 %v3833_v45  ;;  %v3839_v28 = vand.u32 4294901760, %v2937_v32  ;;  %v3298_v32 = vand.u32 4294901760, %v600_v24 }
 0x142   :  { %1405 = vmatpush1.msra.mxu1 %v2939_v33  ;;  %1237 = vmatprep.subr.mxu0 %v3834_v47  ;;  %v3287_v33 = vand.u32 4294901760, %v603_v53 }
 0x143   :  { %1407 = vmatprep.subr.mxu1 %v2949_v42  ;;  %1241 = vmatpush1.msra.mxu0 %v3835_v49  ;;  %v3296_v42 = vsub.f32 %v606_v14, %v3276_v55 }
 0x144   :  { %1409 = vmatpush1.msra.mxu1 %v2972_v9  ;;  %1245 = vmatprep.subr.mxu0 %v3836_v51  ;;  %v597_v9 = vld [vmem:[#allocation7 + $0x118] sm:$0xff]  ;;  %v3308_v1 = vsub.f32 %v603_v53, %v3287_v33  ;;  %v3378_v53 = vsub.f32 %v588_v41, %v3349_v12 }
 0x145   :  { %1411 = vmatprep.subr.mxu1 %v2978_v25  ;;  %1249 = vmatpush1.msra.mxu0 %v3837_v20  ;;  %v3842_v25 = vand.u32 4294901760, %v2965_v7  ;;  %v591_v7 = vld [vmem:[#allocation7 + $0xe8] sm:$0xff]  ;;  %v1583_v36 = vand.u32 4294901760, %v3296_v42  ;;  %v3854_v20 = vand.u32 4294901760, %v3820_v58 }
 0x146   :  { %1413 = vmatpush1.msra.mxu1 %v2986_v59  ;;  %1253 = vmatprep.subr.mxu0 %v3838_v16  ;;  %v594_v59 = vld [vmem:[#allocation7 + $0x100] sm:$0xff]  ;;  %v1590_v44 = vand.u32 4294901760, %v3308_v1  ;;  %v3334_v46 = vand.u32 4294901760, %v591_v7 }
 0x147   :  { %1415 = vmatprep.subr.mxu1 %v2995_v10  ;;  %1257 = vmatpush1.msra.mxu0 %v3839_v28  ;;  %v3844_v10 = vand.u32 4294901760, %v2993_v6  ;;  %v3325_v6 = vand.u32 4294901760, %v594_v59 }
 0x148   :  { %1417 = vmatpush1.msra.mxu1 %v3002_v15  ;;  %1261 = vmatprep.subr.mxu0 %v3840_v23  ;;  %v3313_v15 = vand.u32 4294901760, %v597_v9  ;;  %v1591_v45 = vsub.f32 %v3308_v1, %v1590_v44  ;;  %v3364_v47 = vsub.f32 %v591_v7, %v3334_v46  ;;  %v573_v7 = vld [vmem:[#allocation7 + $0x58] sm:$0xff] }
 0x149   :  { %1419 = vmatprep.subr.mxu1 %v3009_v31  ;;  %1265 = vmatpush1.msra.mxu0 %v3841_v27  ;;  %v1576_v31 = vand.u32 4294901760, %v3285_v19  ;;  %v3355_v39 = vsub.f32 %v594_v59, %v3325_v6  ;;  %v576_v27 = vld [vmem:[#allocation7 + $0x70] sm:$0xff] }
 0x14a   :  { %1421 = vmatpush1.msra.mxu1 %v3019_v3  ;;  %1269 = vmatprep.subr.mxu0 %v3842_v25  ;;  %v3320_v3 = vsub.f32 %v600_v24, %v3298_v32  ;;  %v3855_v24 = vand.u32 4294901760, %v3821_v18  ;;  %v1592_v28 = vand.u32 4294901760, %v1591_v45  ;;  %v1618_v23 = vand.u32 4294901760, %v3364_v47 }
 0x14b   :  { %1423 = vmatprep.subr.mxu1 %v3029_v5  ;;  %1273 = vmatpush1.msra.mxu0 %v3843_v40  ;;  %v3845_v5 = vand.u32 4294901760, %v3807_v29  ;;  %v1577_v29 = vsub.f32 %v3285_v19, %v1576_v31  ;;  %v1611_v16 = vand.u32 4294901760, %v3355_v39  ;;  %v3857_v18 = vand.u32 4294901760, %v3823_v11 }
 0x14c   :  { %1425 = vmatpush1.msra.mxu1 %v3052_v54  ;;  %1277 = vmatprep.subr.mxu0 %v3844_v10  ;;  %v3846_v54 = vand.u32 4294901760, %v3808_v26  ;;  %v3340_v26 = vsub.f32 %v597_v9, %v3313_v15  ;;  %v1597_v48 = vand.u32 4294901760, %v3320_v3  ;;  %v3856_v9 = vand.u32 4294901760, %v3822_v43 }
 0x14d   :  { %1427 = vmatprep.subr.mxu1 %v3058_v0  ;;  %1281 = vmatpush1.msra.mxu0 %v3845_v5  ;;  %v3847_v0 = vand.u32 4294901760, %v3810_v22  ;;  %v1584_v22 = vsub.f32 %v3296_v42, %v1583_v36  ;;  %v1625_v10 = vand.u32 4294901760, %v3378_v53  ;;  %v3858_v43 = vand.u32 4294901760, %v3824_v35 }
 0x14e   :  { %1429 = vmatpush1.msra.mxu1 %v3066_v61  ;;  %1285 = vmatprep.subr.mxu0 %v3846_v54  ;;  %v3848_v61 = vand.u32 4294901760, %v3812_v57  ;;  %v3850_v57 = vand.u32 4294901760, %v3815_v50  ;;  %v1604_v50 = vand.u32 4294901760, %v3340_v26  ;;  %v1598_v51 = vsub.f32 %v3320_v3, %v1597_v48 }
 0x14f   :  { %1431 = vmatprep.subr.mxu1 %v3809_v56  ;;  %1289 = vmatpush1.msra.mxu0 %v3847_v0  ;;  %v3849_v56 = vand.u32 4294901760, %v3813_v8  ;;  %v1578_v8 = vand.u32 4294901760, %v1577_v29  ;;  %v1585_v49 = vand.u32 4294901760, %v1584_v22  ;;  %v1612_v5 = vsub.f32 %v3355_v39, %v1611_v16  ;;  %v570_v29 = vld [vmem:[#allocation7 + $0x40] sm:$0xff] }
 0x150   :  { %1433 = vmatpush1.msra.mxu1 %v3811_v13  ;;  %1293 = vmatprep.subr.mxu0 %v3848_v61  ;;  %v585_v13 = vld [vmem:[#allocation7 + $0xb8] sm:$0xff]  ;;  %v1605_v58 = vsub.f32 %v3340_v26, %v1604_v50  ;;  %v1599_v59 = vand.u32 4294901760, %v1598_v51  ;;  %v3412_v41 = vand.u32 4294901760, %v576_v27  ;;  %v3859_v11 = vand.u32 4294901760, %v3825_v2 }
 0x151   :  { %1435 = vmatprep.subr.mxu1 %v3089_v63  ;;  %1297 = vmatpush1.msra.mxu0 %v3849_v56  ;;  %v3851_v63 = vand.u32 4294901760, %v3816_v60  ;;  %v3369_v14 = vand.u32 4294901760, %v585_v13  ;;  %v3853_v60 = vld [vmem:[#allocation33_spill] sm:$0xff]  ;;  %v1619_v0 = vsub.f32 %v3364_v47, %v1618_v23  ;;  %v3860_v35 = vand.u32 4294901760, %v3826_v37 }
 0x152   :  { %1437 = vmatpush1.msra.mxu1 %v3814_v4  ;;  %1301 = vmatprep.subr.mxu0 %v3850_v57  ;;  %v582_v4 = vld [vmem:[#allocation7 + $0xa0] sm:$0xff]  ;;  %v1606_v61 = vand.u32 4294901760, %v1605_v58  ;;  %v1626_v2 = vsub.f32 %v3378_v53, %v1625_v10  ;;  %v567_v57 = vld [vmem:[#allocation7 + $0x28] sm:$0xff]  ;;  %v1613_v37 = vand.u32 4294901760, %v1612_v5  ;;  %v3438_v45 = vand.u32 4294901760, %v570_v29 }
 0x153   :  { %1439 = vmatprep.subr.mxu1 %v3109_v62  ;;  %1305 = vmatpush1.msra.mxu0 %v3851_v63  ;;  %v3852_v62 = vand.u32 4294901760, %v3818_v30  ;;  %v3384_v30 = vand.u32 4294901760, %v582_v4  ;;  %v3396_v25 = vsub.f32 %v585_v13, %v3369_v14  ;;  %v3426_v13 = vand.u32 4294901760, %v573_v7 }
 0x154   :  { %1441 = vmatpush1.msra.mxu1 %v3817_v34  ;;  %1474 = vmatprep.mubr.f32.mxu1 %v3805_v38  ;;  %v579_v34 = vld [vmem:[#allocation7 + $0x88] sm:$0xff] }
 0x155   :  { %1309 = vmatprep.subr.mxu0 %v3852_v62  ;;  %1476 = vmatmul.mubr.f32.vlgmr.msra.gmra.mxu1 %v3853_v60  ;;  %v3398_v40 = vand.u32 4294901760, %v579_v34  ;;  %v3410_v54 = vsub.f32 %v582_v4, %v3384_v30  ;;  %v1632_v56 = vand.u32 4294901760, %v3396_v25  ;;  %v1620_v4 = vand.u32 4294901760, %v1619_v0  ;;  %v564_v62 = vld [vmem:[#allocation7 + $0x10] sm:$0xff] }
 0x156   :  { %2398 = vmatprep.subr.mxu1 %v3805_v38  ;;  %1313 = vmatpush1.msra.mxu0 %v3854_v20  ;;  %v3450_v20 = vand.u32 4294901760, %v567_v57  ;;  %v3462_v58 = vand.u32 4294901760, %v564_v62 }
 0x157   :  { %2399 = vmatpush3.msra.mxu1 %v1578_v8  ;;  %1317 = vmatprep.subr.mxu0 %v3855_v24  ;;  %v3424_v22 = vsub.f32 %v579_v34, %v3398_v40  ;;  %v1639_v63 = vand.u32 4294901760, %v3410_v54  ;;  %v3436_v8 = vsub.f32 %v576_v27, %v3412_v41  ;;  %v3448_v34 = vsub.f32 %v573_v7, %v3426_v13 }
 0x158   :  { %2400 = vmatprep.subr.mxu1 %v3805_v38  ;;  %1321 = vmatpush1.msra.mxu0 %v3856_v9  ;;  %v1627_v24 = vand.u32 4294901760, %v1626_v2  ;;  %v3460_v9 = vsub.f32 %v570_v29, %v3438_v45  ;;  %v3482_v29 = vsub.f32 %v564_v62, %v3462_v58 }
 0x159   :  { %2401 = vmatpush3.msra.mxu1 %v1585_v49  ;;  %1325 = vmatprep.subr.mxu0 %v3857_v18  ;;  %v1633_v49 = vsub.f32 %v3396_v25, %v1632_v56  ;;  %v1646_v51 = vand.u32 4294901760, %v3424_v22  ;;  %v1653_v27 = vand.u32 4294901760, %v3436_v8  ;;  %v1660_v7 = vand.u32 4294901760, %v3448_v34 }
 0x15a   :  { %2402 = vmatprep.subr.mxu1 %v3805_v38  ;;  %1329 = vmatpush1.msra.mxu0 %v3858_v43  ;;  %v3472_v43 = vsub.f32 %v567_v57, %v3450_v20  ;;  %v1667_v0 = vand.u32 4294901760, %v3460_v9 }
 0x15b   :  { %2403 = vmatpush3.msra.mxu1 %v1592_v28  ;;  %1333 = vmatprep.subr.mxu0 %v3859_v11  ;;  %v1640_v28 = vsub.f32 %v3410_v54, %v1639_v63  ;;  %v1634_v18 = vand.u32 4294901760, %v1633_v49  ;;  %v1654_v11 = vsub.f32 %v3436_v8, %v1653_v27 }
 0x15c   :  { %2404 = vmatprep.subr.mxu1 %v3805_v38  ;;  %1337 = vmatpush1.msra.mxu0 %v3860_v35  ;;  %v1674_v2 = vand.u32 4294901760, %v3472_v43 }
 0x15d   :  { %1370 = vmatprep.mubr.f32.mxu0 %v3805_v38  ;;  %2405 = vmatpush3.msra.mxu1 %v1599_v59  ;;  %v1647_v59 = vsub.f32 %v3424_v22, %v1646_v51  ;;  %v1641_v5 = vand.u32 4294901760, %v1640_v28  ;;  %v1655_v57 = vand.u32 4294901760, %v1654_v11 }
 0x15e   :  { %1372 = vmatmul.mubr.f32.vlgmr.msra.gmra.mxu0 %v3853_v60  ;;  %2363 = vmatprep.subr.mxu0 %v3805_v38  ;;  %v1675_v49 = vsub.f32 %v3472_v43, %v1674_v2 }
 0x15f   :  { %2406 = vmatprep.subr.mxu1 %v3805_v38  ;;  %2364 = vmatpush3.msra.mxu0 %v3268_v17  ;;  %v1648_v35 = vand.u32 4294901760, %v1647_v59 }
 0x160   :  { %2407 = vmatpush3.msra.mxu1 %v1606_v61  ;;  %2365 = vmatprep.subr.mxu0 %v3805_v38  ;;  %v1661_v61 = vsub.f32 %v3448_v34, %v1660_v7 }
 0x161   :  { %2408 = vmatprep.subr.mxu1 %v3805_v38  ;;  %2366 = vmatpush3.msra.mxu0 %v3276_v55 }
 0x162   :  { %2409 = vmatpush3.msra.mxu1 %v1613_v37  ;;  %2367 = vmatprep.subr.mxu0 %v3805_v38  ;;  %v1668_v37 = vsub.f32 %v3460_v9, %v1667_v0  ;;  %v1662_v62 = vand.u32 4294901760, %v1661_v61 }
 0x163   :  { %2410 = vmatprep.subr.mxu1 %v3805_v38  ;;  %2368 = vmatpush3.msra.mxu0 %v3287_v33 }
 0x164   :  { %2411 = vmatpush3.msra.mxu1 %v1620_v4  ;;  %2369 = vmatprep.subr.mxu0 %v3805_v38  ;;  %v1681_v4 = vand.u32 4294901760, %v3482_v29 }
 0x165   :  { %2412 = vmatprep.subr.mxu1 %v3805_v38  ;;  %2370 = vmatpush3.msra.mxu0 %v3298_v32 }
 0x166   :  { %2413 = vmatpush3.msra.mxu1 %v1627_v24  ;;  %2371 = vmatprep.subr.mxu0 %v3805_v38  ;;  %v1669_v24 = vand.u32 4294901760, %v1668_v37  ;;  %v1682_v28 = vsub.f32 %v3482_v29, %v1681_v4 }
 0x167   :  { %2414 = vmatprep.subr.mxu1 %v3805_v38  ;;  %2372 = vmatpush3.msra.mxu0 %v3313_v15 }
 0x168   :  { %2415 = vmatpush3.msra.mxu1 %v1634_v18  ;;  %2373 = vmatprep.subr.mxu0 %v3805_v38  ;;  %v1676_v18 = vand.u32 4294901760, %v1675_v49  ;;  %v1683_v59 = vand.u32 4294901760, %v1682_v28 }
 0x169   :  { %2416 = vmatprep.subr.mxu1 %v3805_v38  ;;  %2374 = vmatpush3.msra.mxu0 %v3325_v6 }
 0x16a   :  { %2417 = vmatpush3.msra.mxu1 %v1641_v5  ;;  %2375 = vmatprep.subr.mxu0 %v3805_v38  ;;  %v3861_v5 = vld [vmem:[#allocation34_spill] sm:$0xff] }
 0x16b   :  { %2418 = vmatprep.subr.mxu1 %v3805_v38  ;;  %2376 = vmatpush3.msra.mxu0 %v3334_v46 }
 0x16c   :  { %2419 = vmatpush3.msra.mxu1 %v1648_v35  ;;  %2377 = vmatprep.subr.mxu0 %v3805_v38 }
 0x16d   :  { %2420 = vmatprep.subr.mxu1 %v3805_v38  ;;  %2378 = vmatpush3.msra.mxu0 %v3349_v12 }
 0x16e   :  { %2421 = vmatpush3.msra.mxu1 %v1655_v57  ;;  %2379 = vmatprep.subr.mxu0 %v3805_v38 }
 0x16f   :  { %2422 = vmatprep.subr.mxu1 %v3805_v38  ;;  %2380 = vmatpush3.msra.mxu0 %v3369_v14 }
 0x170   :  { %2423 = vmatpush3.msra.mxu1 %v1662_v62  ;;  %2381 = vmatprep.subr.mxu0 %v3805_v38 }
 0x171   :  { %2424 = vmatprep.subr.mxu1 %v3805_v38  ;;  %2382 = vmatpush3.msra.mxu0 %v3384_v30 }
 0x172   :  { %2425 = vmatpush3.msra.mxu1 %v1669_v24  ;;  %2383 = vmatprep.subr.mxu0 %v3805_v38 }
 0x173   :  { %2426 = vmatprep.subr.mxu1 %v3805_v38  ;;  %2384 = vmatpush3.msra.mxu0 %v3398_v40 }
 0x174   :  { %2427 = vmatpush3.msra.mxu1 %v1676_v18  ;;  %2385 = vmatprep.subr.mxu0 %v3805_v38 }
 0x175   :  { %2428 = vmatprep.subr.mxu1 %v3805_v38  ;;  %2386 = vmatpush3.msra.mxu0 %v3412_v41 }
 0x176   :  { %2429 = vmatpush3.msra.mxu1 %v1683_v59  ;;  %2430 = vmatprep.mubr.msk.f32.mxu1 %vm2683_vm0, %v3805_v38 }
 0x177   :  { %2387 = vmatprep.subr.mxu0 %v3805_v38  ;;  %2431 = vmatmul.mubr.f32.vlgmr.msra.gmra.mxu1 %v3853_v60 }
 0x178   :  { %2468 = vmatprep.subr.mxu1 %v3805_v38  ;;  %2388 = vmatpush3.msra.mxu0 %v3426_v13 }
 0x179   :  { %2469 = vmatpush3.msra.mxu1 %v3268_v17  ;;  %2389 = vmatprep.subr.mxu0 %v3805_v38 }
 0x17a   :  { %2470 = vmatprep.subr.mxu1 %v3805_v38  ;;  %2390 = vmatpush3.msra.mxu0 %v3438_v45 }
 0x17b   :  { %2471 = vmatpush3.msra.mxu1 %v3276_v55  ;;  %2391 = vmatprep.subr.mxu0 %v3805_v38 }
 0x17c   :  { %2472 = vmatprep.subr.mxu1 %v3805_v38  ;;  %2392 = vmatpush3.msra.mxu0 %v3450_v20 }
 0x17d   :  { %2473 = vmatpush3.msra.mxu1 %v3287_v33  ;;  %2393 = vmatprep.subr.mxu0 %v3805_v38 }
 0x17e   :  { %2474 = vmatprep.subr.mxu1 %v3805_v38  ;;  %2394 = vmatpush3.msra.mxu0 %v3462_v58 }
 0x17f   :  { %2395 = vmatprep.mubr.msk.f32.mxu0 %vm2683_vm0, %v3805_v38  ;;  %2475 = vmatpush3.msra.mxu1 %v3298_v32 }
 0x180   :  { %2396 = vmatmul.mubr.f32.vlgmr.msra.gmra.mxu0 %v3861_v5  ;;  %2433 = vmatprep.subr.mxu0 %v3805_v38 }
 0x181   :  { %2476 = vmatprep.subr.mxu1 %v3805_v38  ;;  %2434 = vmatpush3.msra.mxu0 %v3285_v19 }
 0x182   :  { %2477 = vmatpush3.msra.mxu1 %v3313_v15  ;;  %2435 = vmatprep.subr.mxu0 %v3805_v38 }
 0x183   :  { %2478 = vmatprep.subr.mxu1 %v3805_v38  ;;  %2436 = vmatpush3.msra.mxu0 %v3296_v42 }
 0x184   :  { %2479 = vmatpush3.msra.mxu1 %v3325_v6  ;;  %2437 = vmatprep.subr.mxu0 %v3805_v38 }
 0x185   :  { %2480 = vmatprep.subr.mxu1 %v3805_v38  ;;  %2438 = vmatpush3.msra.mxu0 %v3308_v1 }
 0x186   :  { %2481 = vmatpush3.msra.mxu1 %v3334_v46  ;;  %2439 = vmatprep.subr.mxu0 %v3805_v38 }
 0x187   :  { %2482 = vmatprep.subr.mxu1 %v3805_v38  ;;  %2440 = vmatpush3.msra.mxu0 %v3320_v3 }
 0x188   :  { %2483 = vmatpush3.msra.mxu1 %v3349_v12  ;;  %2441 = vmatprep.subr.mxu0 %v3805_v38 }
 0x189   :  { %2484 = vmatprep.subr.mxu1 %v3805_v38  ;;  %2442 = vmatpush3.msra.mxu0 %v3340_v26 }
 0x18a   :  { %2485 = vmatpush3.msra.mxu1 %v3369_v14  ;;  %2443 = vmatprep.subr.mxu0 %v3805_v38 }
 0x18b   :  { %2486 = vmatprep.subr.mxu1 %v3805_v38  ;;  %2444 = vmatpush3.msra.mxu0 %v3355_v39 }
 0x18c   :  { %2487 = vmatpush3.msra.mxu1 %v3384_v30  ;;  %2445 = vmatprep.subr.mxu0 %v3805_v38 }
 0x18d   :  { %2488 = vmatprep.subr.mxu1 %v3805_v38  ;;  %2446 = vmatpush3.msra.mxu0 %v3364_v47 }
 0x18e   :  { %2489 = vmatpush3.msra.mxu1 %v3398_v40  ;;  %2447 = vmatprep.subr.mxu0 %v3805_v38 }
 0x18f   :  { %2490 = vmatprep.subr.mxu1 %v3805_v38  ;;  %2448 = vmatpush3.msra.mxu0 %v3378_v53 }
 0x190   :  { %2491 = vmatpush3.msra.mxu1 %v3412_v41  ;;  %2449 = vmatprep.subr.mxu0 %v3805_v38 }
 0x191   :  { %2492 = vmatprep.subr.mxu1 %v3805_v38  ;;  %2450 = vmatpush3.msra.mxu0 %v3396_v25 }
 0x192   :  { %2493 = vmatpush3.msra.mxu1 %v3426_v13  ;;  %2451 = vmatprep.subr.mxu0 %v3805_v38 }
 0x193   :  { %2494 = vmatprep.subr.mxu1 %v3805_v38  ;;  %2452 = vmatpush3.msra.mxu0 %v3410_v54 }
 0x194   :  { %2495 = vmatpush3.msra.mxu1 %v3438_v45  ;;  %2453 = vmatprep.subr.mxu0 %v3805_v38 }
 0x195   :  { %2496 = vmatprep.subr.mxu1 %v3805_v38  ;;  %2454 = vmatpush3.msra.mxu0 %v3424_v22 }
 0x196   :  { %2497 = vmatpush3.msra.mxu1 %v3450_v20  ;;  %2455 = vmatprep.subr.mxu0 %v3805_v38 }
 0x197   :  { %2498 = vmatprep.subr.mxu1 %v3805_v38  ;;  %2456 = vmatpush3.msra.mxu0 %v3436_v8 }
 0x198   :  { %2499 = vmatpush3.msra.mxu1 %v3462_v58  ;;  %2500 = vmatprep.mubr.msk.f32.mxu1 %vm2683_vm0, %v3805_v38 }
 0x199   :  { %2457 = vmatprep.subr.mxu0 %v3805_v38  ;;  %2501 = vmatmul.mubr.f32.vlgmr.msra.gmra.mxu1 %v3166_v21 }
 0x19a   :  { %2538 = vmatprep.subr.mxu1 %v3805_v38  ;;  %2458 = vmatpush3.msra.mxu0 %v3448_v34 }
 0x19b   :  { %2539 = vmatpush3.msra.mxu1 %v3268_v17  ;;  %2459 = vmatprep.subr.mxu0 %v3805_v38 }
 0x19c   :  { %2540 = vmatprep.subr.mxu1 %v3805_v38  ;;  %2460 = vmatpush3.msra.mxu0 %v3460_v9 }
 0x19d   :  { %2541 = vmatpush3.msra.mxu1 %v3276_v55  ;;  %2461 = vmatprep.subr.mxu0 %v3805_v38  ;;  %v610_v55 = vld [vmem:[%s3704_s4] sm:$0x7]  ;;  %s2684_s4 = smov [#allocation8]  }
 0x19e   :  { %2542 = vmatprep.subr.mxu1 %v3805_v38  ;;  %2462 = vmatpush3.msra.mxu0 %v3472_v43  ;;  %s2151_s12 = sshll.u32 %s2684_s4, 4  ;;  %s2152_s12 = int_to_ptr.vmem [resolvable:$true] %s2151_s12 }
 0x19f   :  { %2543 = vmatpush3.msra.mxu1 %v3287_v33  ;;  %2463 = vmatprep.subr.mxu0 %v3805_v38  ;;  %s2649_s13 = scalar_lea.vmem %s2152_s12, 384  ;;  %p2654_p2 = scmp.lt.s32.totalorder %s2152_s12, %s2152_s12 }
 0x1a0   :  { %2544 = vmatprep.subr.mxu1 %v3805_v38  ;;  %2464 = vmatpush3.msra.mxu0 %v3482_v29  ;;  %p2650_p1 = scmp.ne.s32.totalorder %s2152_s12, %s2649_s13  ;;  %p2655_p3 = scmp.lt.s32.totalorder %s2649_s13, %s2649_s13 }
 0x1a1   :  { %2465 = vmatprep.mubr.msk.f32.mxu0 %vm2683_vm0, %v3805_v38  ;;  %2545 = vmatpush3.msra.mxu1 %v3298_v32 }
 0x1a2   :  { %2466 = vmatmul.mubr.f32.vlgmr.msra.gmra.mxu0 %v3160_v52  ;;  %2503 = vmatprep.subr.mxu0 %v3805_v38  ;;  %v612_v52 = vlaneseq  ;;  %p2656_p4 = por %p2655_p3, %p2654_p2 }
 0x1a3   :  { %2546 = vmatprep.subr.mxu1 %v3805_v38  ;;  %2504 = vmatpush3.msra.mxu0 %v1576_v31 }
 0x1a4   :  { %2547 = vmatpush3.msra.mxu1 %v3313_v15  ;;  %2505 = vmatprep.subr.mxu0 %v3805_v38  ;;  %v613_v21 = vshrl.u32 %v612_v52, 7  ;;  %p2657_p5 = pnand %p2656_p4, %p2650_p1 }
 0x1a5   :  { %2548 = vmatprep.subr.mxu1 %v3805_v38  ;;  %2506 = vmatpush3.msra.mxu0 %v1583_v36 }
 0x1a6   :  { %2549 = vmatpush3.msra.mxu1 %v3325_v6  ;;  %2507 = vmatprep.subr.mxu0 %v3805_v38  ;;  %v614_v17 = vsub.s32 0, %v613_v21  ;;  %v618_v19 = vsub.s32 1, %v613_v21  ;;  %v622_v34 = vsub.s32 2, %v613_v21 }
 0x1a7   :  { %2550 = vmatprep.subr.mxu1 %v3805_v38  ;;  %2508 = vmatpush3.msra.mxu0 %v1590_v44 }
 0x1a8   :  { %2551 = vmatpush3.msra.mxu1 %v3334_v46  ;;  %2509 = vmatprep.subr.mxu0 %v3805_v38  ;;  %v615_v42 = vrot.slane %v610_v55, %v614_v17  ;;  %v619_v32 = vrot.slane %v610_v55, %v618_v19 }
 0x1a9   :  { %2552 = vmatprep.subr.mxu1 %v3805_v38  ;;  %2510 = vmatpush3.msra.mxu0 %v1597_v48 }
 0x1aa   :  { %2553 = vmatpush3.msra.mxu1 %v3349_v12  ;;  %2511 = vmatprep.subr.mxu0 %v3805_v38 }
 0x1ab   :  { %2554 = vmatprep.subr.mxu1 %v3805_v38  ;;  %2512 = vmatpush3.msra.mxu0 %v1604_v50 }
 0x1ac   :  { %2555 = vmatpush3.msra.mxu1 %v3369_v14  ;;  %2513 = vmatprep.subr.mxu0 %v3805_v38 }
 0x1ad   :  { %2556 = vmatprep.subr.mxu1 %v3805_v38  ;;  %2514 = vmatpush3.msra.mxu0 %v1611_v16 }
 0x1ae   :  { %2557 = vmatpush3.msra.mxu1 %v3384_v30  ;;  %2515 = vmatprep.subr.mxu0 %v3805_v38 }
 0x1af   :  { %2558 = vmatprep.subr.mxu1 %v3805_v38  ;;  %2516 = vmatpush3.msra.mxu0 %v1618_v23 }
 0x1b0   :  { %2559 = vmatpush3.msra.mxu1 %v3398_v40  ;;  %2517 = vmatprep.subr.mxu0 %v3805_v38 }
 0x1b1   :  { %2560 = vmatprep.subr.mxu1 %v3805_v38  ;;  %2518 = vmatpush3.msra.mxu0 %v1625_v10 }
 0x1b2   :  { %2561 = vmatpush3.msra.mxu1 %v3412_v41  ;;  %2519 = vmatprep.subr.mxu0 %v3805_v38 }
 0x1b3   :  { %2562 = vmatprep.subr.mxu1 %v3805_v38  ;;  %2520 = vmatpush3.msra.mxu0 %v1632_v56 }
 0x1b4   :  { %2563 = vmatpush3.msra.mxu1 %v3426_v13  ;;  %2521 = vmatprep.subr.mxu0 %v3805_v38 }
 0x1b5   :  { %2564 = vmatprep.subr.mxu1 %v3805_v38  ;;  %2522 = vmatpush3.msra.mxu0 %v1639_v63 }
 0x1b6   :  { %2565 = vmatpush3.msra.mxu1 %v3438_v45  ;;  %2523 = vmatprep.subr.mxu0 %v3805_v38 }
 0x1b7   :  { %2566 = vmatprep.subr.mxu1 %v3805_v38  ;;  %2524 = vmatpush3.msra.mxu0 %v1646_v51 }
 0x1b8   :  { %2567 = vmatpush3.msra.mxu1 %v3450_v20  ;;  %2525 = vmatprep.subr.mxu0 %v3805_v38  ;;  %v623_v20 = vrot.slane %v610_v55, %v622_v34 }
 0x1b9   :  { %2568 = vmatprep.subr.mxu1 %v3805_v38  ;;  %2526 = vmatpush3.msra.mxu0 %v1653_v27 }
 0x1ba   :  { %2569 = vmatpush3.msra.mxu1 %v3462_v58  ;;  %2570 = vmatprep.mubr.msk.f32.mxu1 %vm2683_vm0, %v3805_v38 }
 0x1bb   :  { %2527 = vmatprep.subr.mxu0 %v3805_v38  ;;  %2571 = vmatmul.mubr.f32.vlgmr.msra.gmra.mxu1 %v3853_v60 }
 0x1bc   :  { %2528 = vmatpush3.msra.mxu0 %v1660_v7  ;;  %2535 = vmatprep.mubr.msk.f32.mxu0 %vm2683_vm0, %v3805_v38 }
 0x1bd   :  { %2529 = vmatprep.subr.mxu0 %v3805_v38 }
 0x1be   :  { %2530 = vmatpush3.msra.mxu0 %v1667_v0 }
 0x1bf   :  { %2531 = vmatprep.subr.mxu0 %v3805_v38 }
 0x1c0   :  { %2532 = vmatpush3.msra.mxu0 %v1674_v2 }
 0x1c1   :  { %2533 = vmatprep.subr.mxu0 %v3805_v38 }
 0x1c2   :  { %2534 = vmatpush3.msra.mxu0 %v1681_v4 }
 0x1c3   :  { %2536 = vmatmul.mubr.f32.vlgmr.msra.gmra.mxu0 %v3853_v60 }
 0x1d3   :  { %v962_v31 = vpop.f32.mrf.mxu1 }
 0x1d5   :  { %v964_v3 = vpop.f32.mrf.mxu1 }
 0x1db   :  { %v730_v33 = vpop.f32.mrf.mxu0 }
 0x1dc   :  { %v731_v15 = vadd.f32 %v730_v33, %v615_v42 }
 0x1dd   :  { %v732_v1 = vpop.f32.mrf.mxu0 }
 0x1de   :  { %v733_v36 = vadd.f32 %v732_v1, %v619_v32  ;;  %v963_v6 = vadd.f32 %v962_v31, %v731_v15 }
 0x1e0   :  { %v965_v48 = vadd.f32 %v964_v3, %v733_v36 }
 0x1f3   :  { %v1205_v44 = vpop.f32.mrf.mxu1 }
 0x1f5   :  { %v1207_v39 = vpop.f32.mrf.mxu1 }
 0x1fc   :  { %v1099_v38 = vpop.f32.mrf.mxu0 }
 0x1fd   :  { %v1100_v26 = vadd.f32 %v1099_v38, %v963_v6 }
 0x1fe   :  { %v1101_v46 = vpop.f32.mrf.mxu0 }
 0x1ff   :  { %v1102_v12 = vadd.f32 %v1101_v46, %v965_v48  ;;  %v1206_v47 = vadd.f32 %v1205_v44, %v1100_v26 }
 0x201   :  { %v1208_v53 = vadd.f32 %v1207_v39, %v1102_v12 }
 0x215   :  { %v1477_v50 = vpop.f32.mrf.mxu1 }
 0x217   :  { %v1479_v25 = vpop.f32.mrf.mxu1 }
 0x21e   :  { %v1373_v14 = vpop.f32.mrf.mxu0 }
 0x21f   :  { %v1374_v60 = vadd.f32 %v1373_v14, %v1206_v47 }
 0x220   :  { %v1375_v16 = vpop.f32.mrf.mxu0 }
 0x221   :  { %v1376_v30 = vadd.f32 %v1375_v16, %v1208_v53  ;;  %v1478_v23 = vadd.f32 %v1477_v50, %v1374_v60 }
 0x223   :  { %v1480_v40 = vadd.f32 %v1479_v25, %v1376_v30  ;;  %v2123_v10 = vmul.f32 %v1478_v23, %v1478_v23 }
 0x225   :  { %2124 = vadd.xlane.f32.xlu0 %v2123_v10  ;;  %v2130_v54 = vmul.f32 %v1480_v40, %v1480_v40 }
 0x229   :  { %2131 = vadd.xlane.f32.xlu0 %v2130_v54 }
 0x237   :  { %v1720_v41 = vpop.f32.mrf.mxu1 }
 0x239   :  { %v2432_v56 = vpop.f32.mrf.mxu1 }
 0x240   :  { %v1569_v22 = vpop.f32.mrf.mxu0 }
 0x241   :  { %v1570_v27 = vadd.f32 %v1569_v22, %v623_v20 }
 0x242   :  { %v2397_v13 = vpop.f32.mrf.mxu0 }
 0x243   :  { %v1721_v58 = vadd.f32 %v1720_v41, %v1570_v27 }
 0x259   :  { %v1913_v63 = vpop.f32.mrf.mxu1 }
 0x25b   :  { %v2502_v8 = vpop.f32.mrf.mxu1 }
 0x262   :  { %v1824_v45 = vpop.f32.mrf.mxu0 }
 0x263   :  { %v1825_v43 = vadd.f32 %v1824_v45, %v1721_v58 }
 0x264   :  { %v2467_v51 = vpop.f32.mrf.mxu0 }
 0x265   :  { %v1914_v11 = vadd.f32 %v1913_v63, %v1825_v43 }
 0x27b   :  { %v2119_v9 = vpop.f32.mrf.mxu1 }
 0x27d   :  { %v2572_v7 = vpop.f32.mrf.mxu1 }
 0x283   :  { %v2032_v0 = vpop.f32.mrf.mxu0 }
 0x284   :  { %v2033_v29 = vadd.f32 %v2032_v0, %v1914_v11 }
 0x285   :  { %v2537_v35 = vpop.f32.mrf.mxu0 }
 0x286   :  { %v2120_v61 = vadd.f32 %v2119_v9, %v2033_v29 }
 0x288   :  { %v2138_v2 = vmul.f32 %v2120_v61, %v2120_v61 }
 0x28a   :  { %2139 = vadd.xlane.f32.xlu1 %v2138_v2 }
 0x2ae   :  { %v2125_v57 = vpop.xlane.xlu0 %2124 }
 0x2af   :  { %v2126_v37 = vmax.f32 %v2125_v57, 1e-24 }
 0x2b1   :  { %2583 = vrsqrt.f32 %v2126_v37 }
 0x2b2   :  { %v2132_v4 = vpop.xlane.xlu0 %2131 }
 0x2b3   :  { %v2133_v62 = vmax.f32 %v2132_v4, 1e-24 }
 0x2b5   :  { %2585 = vrsqrt.f32 %v2133_v62 }
 0x2be   :  { %v2584_v49 = vpop.eup %2583 }
 0x2bf   :  { %v2128_v24 = vmul.f32 %v2584_v49, %v1478_v23 }
 0x2c1   :  { %2129 = vst [vmem:[#allocation8] sm:$0xff] %v2128_v24 }
 0x2c2   :  { %v2586_v28 = vpop.eup %2585 }
 0x2c3   :  { %v2135_v18 = vmul.f32 %v2586_v28, %v1480_v40 }
 0x2c5   :  { %2137 = vst [vmem:[#allocation8 + $0x8] sm:$0xff] %v2135_v18 }
 0x313   :  { %v2140_v59 = vpop.xlane.xlu1 %2139 }
 0x314   :  { %v2141_v5 = vmax.f32 %v2140_v59, 1e-24 }
 0x316   :  { %2587 = vrsqrt.f32 %v2141_v5 }
 0x323   :  { %v2588_v52 = vpop.eup %2587 }
 0x324   :  { %v2143_v21 = vmul.f32 %v2588_v52, %v2120_v61 }
 0x326   :  { %2145 = vst [vmem:[#allocation8 + $0x10] sm:$0xff] %v2143_v21 }
 0x327   :  { %2660 = shalt.err (!%p2657_p5)
}
 0x328   :  { %2157 = dma.vmem_to_hbm [thread:$0]  %s2152_s12, 384, %s3705_s5, [#allocation4], %s2676_s21, %s2676_s21, %s2677_s22  }
 0x329   :  { %2673 = dma.done.wait [#allocation4], 384  }
 0x32a   :  { %2674 = vsyncadd [#allocation4], 4294966912 }
 0x32b   :  { %2161 = vsyncpa [#allocation3], 1 }
 0x32c   :  { %2162 = vsyncpa [#allocation6], 1 }
 0x32d   :  { %2163 = vsyncpa [#allocation4], 1 }

</bundles_post_ra>
